<compile_context>
chip_gen: v7x
topology: tpu7x:2x2x1
jax: 0.10.0
libtpu: 0.0.40
codegen_flags: <defaults>
</compile_context>

<pallas_src>
import jax
import jax.numpy as jnp
from jax import lax
from jax.experimental import pallas as pl
from jax.experimental.pallas import tpu as pltpu

# ----------------------------- sizes ---------------------------------------
B = 2          # batch
C_IN = 4       # image channels
HW = 16        # spatial
C_MID = 8      # conv output channels
S = 8          # query sequence length
VOCAB = 32     # vocabulary
D = 32         # embedding dim (text & image)
D_R = 32       # retrieval dim
N_MEM = 16     # memory-bank entries
TOPK = 4       # retrieved neighbours
D_FUSE = 64    # fused vector dim

HW2 = HW * HW          # 256 spatial positions
KC = 9 * C_IN          # 36 im2col columns


# ----------------------- fully fused forward kernel -------------------------
def _vlmrag_kernel(ids_ref,                       # [B, S] int32 (SMEM, prefetch)
                   patches_ref,                   # [B*HW2, 9*C_IN]
                   conv_w_ref, conv_b_ref,
                   tok_emb_ref,
                   img_w_ref, img_b_ref,
                   txt_w_ref, txt_b_ref,
                   proj_w_ref, proj_b_ref,
                   mem_ref,
                   fw1_ref, fb1_ref, fw2_ref, fb2_ref,
                   dec_w_ref, dec_b_ref, lm_w_ref, lm_b_ref,
                   logits_ref, dist_ref):
    f32 = jnp.float32

    # ---- ImageEncoder: conv3x3 (as one patch matmul) + ReLU + global-avg-pool
    y = jnp.dot(patches_ref[...], conv_w_ref[...], preferred_element_type=f32)
    y = jnp.maximum(y + conv_b_ref[...], 0.0)                       # [B*HW2, C_MID]
    feat = jnp.concatenate(
        [jnp.mean(y[b * HW2:(b + 1) * HW2, :], axis=0, keepdims=True)
         for b in range(B)], axis=0)                                # [B, C_MID]

    # ---- TextEncoder pooling: mean of gathered rows == (one-hot counts @ emb)/S.
    # (Valid because the synthesized text head is purely affine.)
    vi = lax.broadcasted_iota(jnp.int32, (1, VOCAB), 1)
    rows = []
    for b in range(B):
        acc = jnp.zeros((1, VOCAB), f32)
        for s in range(S):
            acc = acc + (vi == ids_ref[b, s]).astype(f32)
        rows.append(acc)
    counts = jnp.concatenate(rows, axis=0)                          # [B, VOCAB]
    txt_pooled = jnp.dot(counts, tok_emb_ref[...],
                         preferred_element_type=f32) * (1.0 / S)    # [B, D]

    # ---- encoders' projection heads
    img_e = jnp.dot(feat, img_w_ref[...], preferred_element_type=f32) + img_b_ref[...]
    txt_e = jnp.dot(txt_pooled, txt_w_ref[...], preferred_element_type=f32) + txt_b_ref[...]

    # ---- Retriever: q = proj(cat(text, image)); distances to memory bank
    qcat = jnp.concatenate([txt_e, img_e], axis=-1)                 # [B, 2D] lane concat
    q = jnp.dot(qcat, proj_w_ref[...], preferred_element_type=f32) + proj_b_ref[...]

    mem = mem_ref[...]                                              # [N_MEM, D_R]
    qn = jnp.sum(q * q, axis=-1, keepdims=True)                     # [B, 1]
    ones_row = jnp.ones((1, D_R), f32)
    mem_sq = lax.dot_general(ones_row, mem * mem,                   # [1, N_MEM] (in-kernel)
                             (((1,), (1,)), ((), ())),
                             preferred_element_type=f32)
    cross = lax.dot_general(q, mem, (((1,), (1,)), ((), ())),
                            preferred_element_type=f32)             # [B, N_MEM]
    dist2 = qn + mem_sq - 2.0 * cross                               # squared L2
    # Return Euclidean distances (torch.cdist semantics); clamp fp cancellation.
    dist_ref[...] = jnp.sqrt(jnp.maximum(dist2, 0.0))

    # ---- in-kernel top-k (smallest distance); single retrieval dot after loop
    iota = lax.broadcasted_iota(jnp.int32, dist2.shape, 1).astype(f32)
    big = jnp.float32(1e30)
    d_work = dist2
    mask_sum = jnp.zeros_like(dist2)
    for _ in range(TOPK):
        row_min = jnp.min(d_work, axis=-1, keepdims=True)           # [B, 1]
        idx = jnp.min(jnp.where(d_work == row_min, iota, jnp.float32(N_MEM)),
                      axis=-1, keepdims=True)                       # lowest-index tie-break
        one_hot = (iota == idx).astype(f32)                         # [B, N_MEM]
        mask_sum = mask_sum + one_hot
        d_work = jnp.where(one_hot > 0.5, big, d_work)
    retr = jnp.dot(mask_sum, mem, preferred_element_type=f32) * (1.0 / TOPK)  # [B, D_R]

    # ---- FusionModule MLP on cat(query_vec, retrieved)
    fcat = jnp.concatenate([txt_e, img_e, retr], axis=-1)           # [B, 2D + D_R]
    h1 = jnp.maximum(jnp.dot(fcat, fw1_ref[...], preferred_element_type=f32)
                     + fb1_ref[...], 0.0)
    fused = jnp.dot(h1, fw2_ref[...], preferred_element_type=f32) + fb2_ref[...]

    # ---- Decoder (inference path): projection + LM head
    dh = jnp.maximum(jnp.dot(fused, dec_w_ref[...], preferred_element_type=f32)
                     + dec_b_ref[...], 0.0)
    logits_ref[...] = (jnp.dot(dh, lm_w_ref[...], preferred_element_type=f32)
                       + lm_b_ref[...])


def _zero_map(i, ids_ref):
    return (0, 0)


def vlmrag_fused(params, patches_flat, query_ids):
    operands = (
        patches_flat,
        params["conv_w"], params["conv_b"].reshape(1, -1),
        params["tok_emb"],
        params["img_w"], params["img_b"].reshape(1, -1),
        params["txt_w"], params["txt_b"].reshape(1, -1),
        params["proj_w"], params["proj_b"].reshape(1, -1),
        params["memory"],
        params["fuse_w1"], params["fuse_b1"].reshape(1, -1),
        params["fuse_w2"], params["fuse_b2"].reshape(1, -1),
        params["dec_proj_w"], params["dec_proj_b"].reshape(1, -1),
        params["lm_w"], params["lm_b"].reshape(1, -1),
    )
    in_specs = [pl.BlockSpec(op.shape, _zero_map) for op in operands]
    grid_spec = pltpu.PrefetchScalarGridSpec(
        num_scalar_prefetch=1,              # query_ids -> SMEM
        grid=(1,),                          # single grid step: everything in one launch
        in_specs=in_specs,
        out_specs=(pl.BlockSpec((B, VOCAB), _zero_map),
                   pl.BlockSpec((B, N_MEM), _zero_map)),
    )
    # TODO(synk): if VOCAB / N_MEM ever grow, pad / pack outputs to a lane-dense
    #             128-wide slab to avoid masked partial stores.
    return pl.pallas_call(
        _vlmrag_kernel,
        out_shape=(jax.ShapeDtypeStruct((B, VOCAB), jnp.float32),
                   jax.ShapeDtypeStruct((B, N_MEM), jnp.float32)),
        grid_spec=grid_spec,
        compiler_params=pltpu.CompilerParams(
            dimension_semantics=("arbitrary",)),
    )(query_ids, *operands)


# ------------------------------ glue ----------------------------------------
def im2col_3x3(x_nhwc):
    """3x3, stride 1, pad 1 patches, layout [B, H*W, 9*C]."""
    b, h, w, c = x_nhwc.shape
    xp = jnp.pad(x_nhwc, ((0, 0), (1, 1), (1, 1), (0, 0)))
    cols = [xp[:, dh:dh + h, dw:dw + w, :] for dh in range(3) for dw in range(3)]
    patches = jnp.concatenate(cols, axis=-1)            # [B, H, W, 9*C]
    return patches.reshape(b, h * w, 9 * c)
# TODO(synk): if the spatial size ever grows, DMA the padded NHWC image and do
#             9 shifted-slice dots in-kernel instead of the XLA im2col.


# --------------------------- parameters -------------------------------------
def init_params(key):
    ks = jax.random.split(key, 16)
    sc = 0.02

    def w(k, shape):
        return (sc * jax.random.normal(k, shape)).astype(jnp.float32)

    return {
        # ImageEncoder: conv3x3 (C_IN->C_MID) + proj (C_MID->D)
        "conv_w": w(ks[0], (KC, C_MID)),
        "conv_b": jnp.zeros((C_MID,), jnp.float32),
        "img_w": w(ks[1], (C_MID, D)),
        "img_b": jnp.zeros((D,), jnp.float32),
        # TextEncoder: token embedding + proj (D->D)
        "tok_emb": w(ks[2], (VOCAB, D)),
        "txt_w": w(ks[3], (D, D)),
        "txt_b": jnp.zeros((D,), jnp.float32),
        # Retriever: project(cat(text,img)) -> D_R, memory bank
        "proj_w": w(ks[4], (2 * D, D_R)),
        "proj_b": jnp.zeros((D_R,), jnp.float32),
        "memory": w(ks[5], (N_MEM, D_R)),
        # FusionModule: MLP on cat(query_vec, pooled retrieved)
        "fuse_w1": w(ks[6], (2 * D + D_R, D_FUSE)),
        "fuse_b1": jnp.zeros((D_FUSE,), jnp.float32),
        "fuse_w2": w(ks[7], (D_FUSE, D_FUSE)),
        "fuse_b2": jnp.zeros((D_FUSE,), jnp.float32),
        # Decoder: projection (D_FUSE->D) + LM head (D->VOCAB)
        "dec_proj_w": w(ks[8], (D_FUSE, D)),
        "dec_proj_b": jnp.zeros((D,), jnp.float32),
        "lm_w": w(ks[9], (D, VOCAB)),
        "lm_b": jnp.zeros((VOCAB,), jnp.float32),
    }


# ----------------------------- forward --------------------------------------
def vlmrag_forward(params, image_nchw, query_ids):
    # Light XLA glue: NCHW->NHWC + 3x3 im2col (72 KB), then ONE Pallas launch.
    x = jnp.transpose(image_nchw, (0, 2, 3, 1))
    patches = im2col_3x3(x).reshape(B * HW2, KC)        # [B*H*W, 9*C_IN]
    # TODO(synk): train-mode teacher-forced decoding with target_ids/target_mask
    #             (cross-entropy) is not implemented; only inference logits.
    logits, distances = vlmrag_fused(params, patches, query_ids)
    return logits, distances


# ------------------------------ main -----------------------------------------
if __name__ == "__main__":
    key = jax.random.PRNGKey(0)
    k_param, k_img, k_txt = jax.random.split(key, 3)

    params = init_params(k_param)
    image = jax.random.normal(k_img, (B, C_IN, HW, HW), dtype=jnp.float32)  # NCHW
    query = jax.random.randint(k_txt, (B, S), 0, VOCAB, dtype=jnp.int32)

    logits, distances = jax.jit(vlmrag_forward)(params, image, query)
    jax.block_until_ready((logits, distances))

    assert logits.shape == (B, VOCAB)
    assert distances.shape == (B, N_MEM)
    assert bool(jnp.all(jnp.isfinite(logits))) and bool(jnp.all(jnp.isfinite(distances)))
    assert bool(jnp.all(distances >= 0.0))
    print("KERNEL_OK")
</pallas_src>

<mosaic_0001>
module attributes {stable_mosaic.version = 11 : i64} {
  func.func @_vlmrag_kernel(%arg0: i32, %arg1: memref<2x8xi32, #tpu.memory_space<smem>>, %arg2: memref<512x36xf32, #tpu.memory_space<vmem>>, %arg3: memref<36x8xf32, #tpu.memory_space<vmem>>, %arg4: memref<1x8xf32, #tpu.memory_space<vmem>>, %arg5: memref<32x32xf32, #tpu.memory_space<vmem>>, %arg6: memref<8x32xf32, #tpu.memory_space<vmem>>, %arg7: memref<1x32xf32, #tpu.memory_space<vmem>>, %arg8: memref<32x32xf32, #tpu.memory_space<vmem>>, %arg9: memref<1x32xf32, #tpu.memory_space<vmem>>, %arg10: memref<64x32xf32, #tpu.memory_space<vmem>>, %arg11: memref<1x32xf32, #tpu.memory_space<vmem>>, %arg12: memref<16x32xf32, #tpu.memory_space<vmem>>, %arg13: memref<96x64xf32, #tpu.memory_space<vmem>>, %arg14: memref<1x64xf32, #tpu.memory_space<vmem>>, %arg15: memref<64x64xf32, #tpu.memory_space<vmem>>, %arg16: memref<1x64xf32, #tpu.memory_space<vmem>>, %arg17: memref<64x32xf32, #tpu.memory_space<vmem>>, %arg18: memref<1x32xf32, #tpu.memory_space<vmem>>, %arg19: memref<32x32xf32, #tpu.memory_space<vmem>>, %arg20: memref<1x32xf32, #tpu.memory_space<vmem>>, %arg21: memref<2x32xf32, #tpu.memory_space<vmem>>, %arg22: memref<2x16xf32, #tpu.memory_space<vmem>>) attributes {dimension_semantics = [#tpu.dimension_semantics<arbitrary>], iteration_bounds = array<i64: 1>, scalar_prefetch = 1 : i64, scratch_operands = 0 : i64, tpu.core_type = #tpu.core_type<tc>, window_params = [{pipeline_mode = #tpu.pipeline_mode<synchronous>, transform_indices = @transform_0, window_bounds = array<i64: 512, 36>}, {pipeline_mode = #tpu.pipeline_mode<synchronous>, transform_indices = @transform_1, window_bounds = array<i64: 36, 8>}, {pipeline_mode = #tpu.pipeline_mode<synchronous>, transform_indices = @transform_2, window_bounds = array<i64: 1, 8>}, {pipeline_mode = #tpu.pipeline_mode<synchronous>, transform_indices = @transform_3, window_bounds = array<i64: 32, 32>}, {pipeline_mode = #tpu.pipeline_mode<synchronous>, transform_indices = @transform_4, window_bounds = array<i64: 8, 32>}, {pipeline_mode = #tpu.pipeline_mode<synchronous>, transform_indices = @transform_5, window_bounds = array<i64: 1, 32>}, {pipeline_mode = #tpu.pipeline_mode<synchronous>, transform_indices = @transform_6, window_bounds = array<i64: 32, 32>}, {pipeline_mode = #tpu.pipeline_mode<synchronous>, transform_indices = @transform_7, window_bounds = array<i64: 1, 32>}, {pipeline_mode = #tpu.pipeline_mode<synchronous>, transform_indices = @transform_8, window_bounds = array<i64: 64, 32>}, {pipeline_mode = #tpu.pipeline_mode<synchronous>, transform_indices = @transform_9, window_bounds = array<i64: 1, 32>}, {pipeline_mode = #tpu.pipeline_mode<synchronous>, transform_indices = @transform_10, window_bounds = array<i64: 16, 32>}, {pipeline_mode = #tpu.pipeline_mode<synchronous>, transform_indices = @transform_11, window_bounds = array<i64: 96, 64>}, {pipeline_mode = #tpu.pipeline_mode<synchronous>, transform_indices = @transform_12, window_bounds = array<i64: 1, 64>}, {pipeline_mode = #tpu.pipeline_mode<synchronous>, transform_indices = @transform_13, window_bounds = array<i64: 64, 64>}, {pipeline_mode = #tpu.pipeline_mode<synchronous>, transform_indices = @transform_14, window_bounds = array<i64: 1, 64>}, {pipeline_mode = #tpu.pipeline_mode<synchronous>, transform_indices = @transform_15, window_bounds = array<i64: 64, 32>}, {pipeline_mode = #tpu.pipeline_mode<synchronous>, transform_indices = @transform_16, window_bounds = array<i64: 1, 32>}, {pipeline_mode = #tpu.pipeline_mode<synchronous>, transform_indices = @transform_17, window_bounds = array<i64: 32, 32>}, {pipeline_mode = #tpu.pipeline_mode<synchronous>, transform_indices = @transform_18, window_bounds = array<i64: 1, 32>}, {pipeline_mode = #tpu.pipeline_mode<synchronous>, transform_indices = @transform_19, window_bounds = array<i64: 2, 32>}, {pipeline_mode = #tpu.pipeline_mode<synchronous>, transform_indices = @transform_20, window_bounds = array<i64: 2, 16>}]} {
    %c0 = arith.constant 0 : index
    %c0_0 = arith.constant 0 : index
    %0 = vector.load %arg2[%c0, %c0_0] : memref<512x36xf32, #tpu.memory_space<vmem>>, vector<512x36xf32>
    %c0_1 = arith.constant 0 : index
    %c0_2 = arith.constant 0 : index
    %1 = vector.load %arg3[%c0_1, %c0_2] : memref<36x8xf32, #tpu.memory_space<vmem>>, vector<36x8xf32>
    %cst = arith.constant dense<0.000000e+00> : vector<512x8xf32>
    %2 = tpu.matmul %0, %1, %cst {dimension_numbers = #tpu.dot_dimension_numbers<[1], [0], [0], [1], [0, 0, 1, 1], [], []>} : vector<512x36xf32>, vector<36x8xf32>, vector<512x8xf32> -> vector<512x8xf32>
    %c0_3 = arith.constant 0 : index
    %c0_4 = arith.constant 0 : index
    %3 = vector.load %arg4[%c0_3, %c0_4] : memref<1x8xf32, #tpu.memory_space<vmem>>, vector<1x8xf32>
    %4 = vector.broadcast %3 : vector<1x8xf32> to vector<512x8xf32>
    %5 = arith.addf %2, %4 : vector<512x8xf32>
    %cst_5 = arith.constant 0.000000e+00 : f32
    %6 = vector.broadcast %cst_5 : f32 to vector<512x8xf32>
    %7 = arith.maximumf %5, %6 : vector<512x8xf32>
    %8 = vector.extract_strided_slice %7 {offsets = [0, 0], sizes = [256, 8], strides = [1, 1]} : vector<512x8xf32> to vector<256x8xf32>
    %cst_6 = arith.constant dense<0.000000e+00> : vector<8xf32>
    %9 = vector.multi_reduction <add>, %8, %cst_6 [0] : vector<256x8xf32> to vector<8xf32>
    %10 = vector.shape_cast %9 : vector<8xf32> to vector<1x8xf32>
    %cst_7 = arith.constant 2.560000e+02 : f32
    %11 = vector.broadcast %cst_7 : f32 to vector<1x8xf32>
    %12 = arith.divf %10, %11 : vector<1x8xf32>
    %13 = vector.extract_strided_slice %7 {offsets = [256, 0], sizes = [256, 8], strides = [1, 1]} : vector<512x8xf32> to vector<256x8xf32>
    %cst_8 = arith.constant dense<0.000000e+00> : vector<8xf32>
    %14 = vector.multi_reduction <add>, %13, %cst_8 [0] : vector<256x8xf32> to vector<8xf32>
    %15 = vector.shape_cast %14 : vector<8xf32> to vector<1x8xf32>
    %cst_9 = arith.constant 2.560000e+02 : f32
    %16 = vector.broadcast %cst_9 : f32 to vector<1x8xf32>
    %17 = arith.divf %15, %16 : vector<1x8xf32>
    %18 = tpu.concatenate %12, %17 in 0 : vector<1x8xf32>, vector<1x8xf32> -> vector<2x8xf32>
    %19 = tpu.iota {dimensions = array<i32: 1>} : vector<1x32xi32>
    %cst_10 = arith.constant 0.000000e+00 : f32
    %20 = vector.broadcast %cst_10 : f32 to vector<1x32xf32>
    %c0_11 = arith.constant 0 : index
    %c0_12 = arith.constant 0 : index
    %21 = memref.load %arg1[%c0_11, %c0_12] : memref<2x8xi32, #tpu.memory_space<smem>>
    %22 = vector.broadcast %21 : i32 to vector<1x32xi32>
    %23 = arith.cmpi eq, %19, %22 : vector<1x32xi32>
    %24 = arith.extui %23 : vector<1x32xi1> to vector<1x32xi32>
    %25 = arith.sitofp %24 : vector<1x32xi32> to vector<1x32xf32>
    %26 = arith.addf %20, %25 : vector<1x32xf32>
    %c0_13 = arith.constant 0 : index
    %c1 = arith.constant 1 : index
    %27 = memref.load %arg1[%c0_13, %c1] : memref<2x8xi32, #tpu.memory_space<smem>>
    %28 = vector.broadcast %27 : i32 to vector<1x32xi32>
    %29 = arith.cmpi eq, %19, %28 : vector<1x32xi32>
    %30 = arith.extui %29 : vector<1x32xi1> to vector<1x32xi32>
    %31 = arith.sitofp %30 : vector<1x32xi32> to vector<1x32xf32>
    %32 = arith.addf %26, %31 : vector<1x32xf32>
    %c0_14 = arith.constant 0 : index
    %c2 = arith.constant 2 : index
    %33 = memref.load %arg1[%c0_14, %c2] : memref<2x8xi32, #tpu.memory_space<smem>>
    %34 = vector.broadcast %33 : i32 to vector<1x32xi32>
    %35 = arith.cmpi eq, %19, %34 : vector<1x32xi32>
    %36 = arith.extui %35 : vector<1x32xi1> to vector<1x32xi32>
    %37 = arith.sitofp %36 : vector<1x32xi32> to vector<1x32xf32>
    %38 = arith.addf %32, %37 : vector<1x32xf32>
    %c0_15 = arith.constant 0 : index
    %c3 = arith.constant 3 : index
    %39 = memref.load %arg1[%c0_15, %c3] : memref<2x8xi32, #tpu.memory_space<smem>>
    %40 = vector.broadcast %39 : i32 to vector<1x32xi32>
    %41 = arith.cmpi eq, %19, %40 : vector<1x32xi32>
    %42 = arith.extui %41 : vector<1x32xi1> to vector<1x32xi32>
    %43 = arith.sitofp %42 : vector<1x32xi32> to vector<1x32xf32>
    %44 = arith.addf %38, %43 : vector<1x32xf32>
    %c0_16 = arith.constant 0 : index
    %c4 = arith.constant 4 : index
    %45 = memref.load %arg1[%c0_16, %c4] : memref<2x8xi32, #tpu.memory_space<smem>>
    %46 = vector.broadcast %45 : i32 to vector<1x32xi32>
    %47 = arith.cmpi eq, %19, %46 : vector<1x32xi32>
    %48 = arith.extui %47 : vector<1x32xi1> to vector<1x32xi32>
    %49 = arith.sitofp %48 : vector<1x32xi32> to vector<1x32xf32>
    %50 = arith.addf %44, %49 : vector<1x32xf32>
    %c0_17 = arith.constant 0 : index
    %c5 = arith.constant 5 : index
    %51 = memref.load %arg1[%c0_17, %c5] : memref<2x8xi32, #tpu.memory_space<smem>>
    %52 = vector.broadcast %51 : i32 to vector<1x32xi32>
    %53 = arith.cmpi eq, %19, %52 : vector<1x32xi32>
    %54 = arith.extui %53 : vector<1x32xi1> to vector<1x32xi32>
    %55 = arith.sitofp %54 : vector<1x32xi32> to vector<1x32xf32>
    %56 = arith.addf %50, %55 : vector<1x32xf32>
    %c0_18 = arith.constant 0 : index
    %c6 = arith.constant 6 : index
    %57 = memref.load %arg1[%c0_18, %c6] : memref<2x8xi32, #tpu.memory_space<smem>>
    %58 = vector.broadcast %57 : i32 to vector<1x32xi32>
    %59 = arith.cmpi eq, %19, %58 : vector<1x32xi32>
    %60 = arith.extui %59 : vector<1x32xi1> to vector<1x32xi32>
    %61 = arith.sitofp %60 : vector<1x32xi32> to vector<1x32xf32>
    %62 = arith.addf %56, %61 : vector<1x32xf32>
    %c0_19 = arith.constant 0 : index
    %c7 = arith.constant 7 : index
    %63 = memref.load %arg1[%c0_19, %c7] : memref<2x8xi32, #tpu.memory_space<smem>>
    %64 = vector.broadcast %63 : i32 to vector<1x32xi32>
    %65 = arith.cmpi eq, %19, %64 : vector<1x32xi32>
    %66 = arith.extui %65 : vector<1x32xi1> to vector<1x32xi32>
    %67 = arith.sitofp %66 : vector<1x32xi32> to vector<1x32xf32>
    %68 = arith.addf %62, %67 : vector<1x32xf32>
    %cst_20 = arith.constant 0.000000e+00 : f32
    %69 = vector.broadcast %cst_20 : f32 to vector<1x32xf32>
    %c1_21 = arith.constant 1 : index
    %c0_22 = arith.constant 0 : index
    %70 = memref.load %arg1[%c1_21, %c0_22] : memref<2x8xi32, #tpu.memory_space<smem>>
    %71 = vector.broadcast %70 : i32 to vector<1x32xi32>
    %72 = arith.cmpi eq, %19, %71 : vector<1x32xi32>
    %73 = arith.extui %72 : vector<1x32xi1> to vector<1x32xi32>
    %74 = arith.sitofp %73 : vector<1x32xi32> to vector<1x32xf32>
    %75 = arith.addf %69, %74 : vector<1x32xf32>
    %c1_23 = arith.constant 1 : index
    %c1_24 = arith.constant 1 : index
    %76 = memref.load %arg1[%c1_23, %c1_24] : memref<2x8xi32, #tpu.memory_space<smem>>
    %77 = vector.broadcast %76 : i32 to vector<1x32xi32>
    %78 = arith.cmpi eq, %19, %77 : vector<1x32xi32>
    %79 = arith.extui %78 : vector<1x32xi1> to vector<1x32xi32>
    %80 = arith.sitofp %79 : vector<1x32xi32> to vector<1x32xf32>
    %81 = arith.addf %75, %80 : vector<1x32xf32>
    %c1_25 = arith.constant 1 : index
    %c2_26 = arith.constant 2 : index
    %82 = memref.load %arg1[%c1_25, %c2_26] : memref<2x8xi32, #tpu.memory_space<smem>>
    %83 = vector.broadcast %82 : i32 to vector<1x32xi32>
    %84 = arith.cmpi eq, %19, %83 : vector<1x32xi32>
    %85 = arith.extui %84 : vector<1x32xi1> to vector<1x32xi32>
    %86 = arith.sitofp %85 : vector<1x32xi32> to vector<1x32xf32>
    %87 = arith.addf %81, %86 : vector<1x32xf32>
    %c1_27 = arith.constant 1 : index
    %c3_28 = arith.constant 3 : index
    %88 = memref.load %arg1[%c1_27, %c3_28] : memref<2x8xi32, #tpu.memory_space<smem>>
    %89 = vector.broadcast %88 : i32 to vector<1x32xi32>
    %90 = arith.cmpi eq, %19, %89 : vector<1x32xi32>
    %91 = arith.extui %90 : vector<1x32xi1> to vector<1x32xi32>
    %92 = arith.sitofp %91 : vector<1x32xi32> to vector<1x32xf32>
    %93 = arith.addf %87, %92 : vector<1x32xf32>
    %c1_29 = arith.constant 1 : index
    %c4_30 = arith.constant 4 : index
    %94 = memref.load %arg1[%c1_29, %c4_30] : memref<2x8xi32, #tpu.memory_space<smem>>
    %95 = vector.broadcast %94 : i32 to vector<1x32xi32>
    %96 = arith.cmpi eq, %19, %95 : vector<1x32xi32>
    %97 = arith.extui %96 : vector<1x32xi1> to vector<1x32xi32>
    %98 = arith.sitofp %97 : vector<1x32xi32> to vector<1x32xf32>
    %99 = arith.addf %93, %98 : vector<1x32xf32>
    %c1_31 = arith.constant 1 : index
    %c5_32 = arith.constant 5 : index
    %100 = memref.load %arg1[%c1_31, %c5_32] : memref<2x8xi32, #tpu.memory_space<smem>>
    %101 = vector.broadcast %100 : i32 to vector<1x32xi32>
    %102 = arith.cmpi eq, %19, %101 : vector<1x32xi32>
    %103 = arith.extui %102 : vector<1x32xi1> to vector<1x32xi32>
    %104 = arith.sitofp %103 : vector<1x32xi32> to vector<1x32xf32>
    %105 = arith.addf %99, %104 : vector<1x32xf32>
    %c1_33 = arith.constant 1 : index
    %c6_34 = arith.constant 6 : index
    %106 = memref.load %arg1[%c1_33, %c6_34] : memref<2x8xi32, #tpu.memory_space<smem>>
    %107 = vector.broadcast %106 : i32 to vector<1x32xi32>
    %108 = arith.cmpi eq, %19, %107 : vector<1x32xi32>
    %109 = arith.extui %108 : vector<1x32xi1> to vector<1x32xi32>
    %110 = arith.sitofp %109 : vector<1x32xi32> to vector<1x32xf32>
    %111 = arith.addf %105, %110 : vector<1x32xf32>
    %c1_35 = arith.constant 1 : index
    %c7_36 = arith.constant 7 : index
    %112 = memref.load %arg1[%c1_35, %c7_36] : memref<2x8xi32, #tpu.memory_space<smem>>
    %113 = vector.broadcast %112 : i32 to vector<1x32xi32>
    %114 = arith.cmpi eq, %19, %113 : vector<1x32xi32>
    %115 = arith.extui %114 : vector<1x32xi1> to vector<1x32xi32>
    %116 = arith.sitofp %115 : vector<1x32xi32> to vector<1x32xf32>
    %117 = arith.addf %111, %116 : vector<1x32xf32>
    %118 = tpu.concatenate %68, %117 in 0 : vector<1x32xf32>, vector<1x32xf32> -> vector<2x32xf32>
    %c0_37 = arith.constant 0 : index
    %c0_38 = arith.constant 0 : index
    %119 = vector.load %arg5[%c0_37, %c0_38] : memref<32x32xf32, #tpu.memory_space<vmem>>, vector<32x32xf32>
    %cst_39 = arith.constant dense<0.000000e+00> : vector<2x32xf32>
    %120 = tpu.matmul %118, %119, %cst_39 {dimension_numbers = #tpu.dot_dimension_numbers<[1], [0], [0], [1], [0, 0, 1, 1], [], []>} : vector<2x32xf32>, vector<32x32xf32>, vector<2x32xf32> -> vector<2x32xf32>
    %cst_40 = arith.constant 1.250000e-01 : f32
    %121 = vector.broadcast %cst_40 : f32 to vector<2x32xf32>
    %122 = arith.mulf %120, %121 : vector<2x32xf32>
    %c0_41 = arith.constant 0 : index
    %c0_42 = arith.constant 0 : index
    %123 = vector.load %arg6[%c0_41, %c0_42] : memref<8x32xf32, #tpu.memory_space<vmem>>, vector<8x32xf32>
    %cst_43 = arith.constant dense<0.000000e+00> : vector<2x32xf32>
    %124 = tpu.matmul %18, %123, %cst_43 {dimension_numbers = #tpu.dot_dimension_numbers<[1], [0], [0], [1], [0, 0, 1, 1], [], []>} : vector<2x8xf32>, vector<8x32xf32>, vector<2x32xf32> -> vector<2x32xf32>
    %c0_44 = arith.constant 0 : index
    %c0_45 = arith.constant 0 : index
    %125 = vector.load %arg7[%c0_44, %c0_45] : memref<1x32xf32, #tpu.memory_space<vmem>>, vector<1x32xf32>
    %126 = vector.broadcast %125 : vector<1x32xf32> to vector<2x32xf32>
    %127 = arith.addf %124, %126 : vector<2x32xf32>
    %c0_46 = arith.constant 0 : index
    %c0_47 = arith.constant 0 : index
    %128 = vector.load %arg8[%c0_46, %c0_47] : memref<32x32xf32, #tpu.memory_space<vmem>>, vector<32x32xf32>
    %cst_48 = arith.constant dense<0.000000e+00> : vector<2x32xf32>
    %129 = tpu.matmul %122, %128, %cst_48 {dimension_numbers = #tpu.dot_dimension_numbers<[1], [0], [0], [1], [0, 0, 1, 1], [], []>} : vector<2x32xf32>, vector<32x32xf32>, vector<2x32xf32> -> vector<2x32xf32>
    %c0_49 = arith.constant 0 : index
    %c0_50 = arith.constant 0 : index
    %130 = vector.load %arg9[%c0_49, %c0_50] : memref<1x32xf32, #tpu.memory_space<vmem>>, vector<1x32xf32>
    %131 = vector.broadcast %130 : vector<1x32xf32> to vector<2x32xf32>
    %132 = arith.addf %129, %131 : vector<2x32xf32>
    %133 = tpu.concatenate %132, %127 in 1 : vector<2x32xf32>, vector<2x32xf32> -> vector<2x64xf32>
    %c0_51 = arith.constant 0 : index
    %c0_52 = arith.constant 0 : index
    %134 = vector.load %arg10[%c0_51, %c0_52] : memref<64x32xf32, #tpu.memory_space<vmem>>, vector<64x32xf32>
    %cst_53 = arith.constant dense<0.000000e+00> : vector<2x32xf32>
    %135 = tpu.matmul %133, %134, %cst_53 {dimension_numbers = #tpu.dot_dimension_numbers<[1], [0], [0], [1], [0, 0, 1, 1], [], []>} : vector<2x64xf32>, vector<64x32xf32>, vector<2x32xf32> -> vector<2x32xf32>
    %c0_54 = arith.constant 0 : index
    %c0_55 = arith.constant 0 : index
    %136 = vector.load %arg11[%c0_54, %c0_55] : memref<1x32xf32, #tpu.memory_space<vmem>>, vector<1x32xf32>
    %137 = vector.broadcast %136 : vector<1x32xf32> to vector<2x32xf32>
    %138 = arith.addf %135, %137 : vector<2x32xf32>
    %c0_56 = arith.constant 0 : index
    %c0_57 = arith.constant 0 : index
    %139 = vector.load %arg12[%c0_56, %c0_57] : memref<16x32xf32, #tpu.memory_space<vmem>>, vector<16x32xf32>
    %140 = arith.mulf %138, %138 : vector<2x32xf32>
    %cst_58 = arith.constant dense<0.000000e+00> : vector<2xf32>
    %141 = vector.multi_reduction <add>, %140, %cst_58 [1] : vector<2x32xf32> to vector<2xf32>
    %142 = vector.shape_cast %141 : vector<2xf32> to vector<2x1xf32>
    %cst_59 = arith.constant 1.000000e+00 : f32
    %143 = vector.broadcast %cst_59 : f32 to vector<1x32xf32>
    %144 = arith.mulf %139, %139 : vector<16x32xf32>
    %cst_60 = arith.constant dense<0.000000e+00> : vector<1x16xf32>
    %145 = tpu.matmul %143, %144, %cst_60 {dimension_numbers = #tpu.dot_dimension_numbers<[1], [1], [0], [0], [0, 0, 1, 0], [], []>} : vector<1x32xf32>, vector<16x32xf32>, vector<1x16xf32> -> vector<1x16xf32>
    %cst_61 = arith.constant dense<0.000000e+00> : vector<2x16xf32>
    %146 = tpu.matmul %138, %139, %cst_61 {dimension_numbers = #tpu.dot_dimension_numbers<[1], [1], [0], [0], [0, 0, 1, 0], [], []>} : vector<2x32xf32>, vector<16x32xf32>, vector<2x16xf32> -> vector<2x16xf32>
    %147 = vector.broadcast %142 : vector<2x1xf32> to vector<2x16xf32>
    %148 = vector.broadcast %145 : vector<1x16xf32> to vector<2x16xf32>
    %149 = arith.addf %147, %148 : vector<2x16xf32>
    %cst_62 = arith.constant 2.000000e+00 : f32
    %150 = vector.broadcast %cst_62 : f32 to vector<2x16xf32>
    %151 = arith.mulf %150, %146 : vector<2x16xf32>
    %152 = arith.subf %149, %151 : vector<2x16xf32>
    %cst_63 = arith.constant 0.000000e+00 : f32
    %153 = vector.broadcast %cst_63 : f32 to vector<2x16xf32>
    %154 = arith.maximumf %152, %153 : vector<2x16xf32>
    %155 = math.sqrt %154 : vector<2x16xf32>
    %c0_64 = arith.constant 0 : index
    %c0_65 = arith.constant 0 : index
    %156 = vector.load %arg22[%c0_64, %c0_65] : memref<2x16xf32, #tpu.memory_space<vmem>>, vector<2x16xf32>
    tpu.vector_store %arg22[%c0_64, %c0_65], %155 {strides = array<i32>} : memref<2x16xf32, #tpu.memory_space<vmem>>, vector<2x16xf32>,
    %157 = tpu.iota {dimensions = array<i32: 1>} : vector<2x16xi32>
    %158 = arith.sitofp %157 : vector<2x16xi32> to vector<2x16xf32>
    %cst_66 = arith.constant 0.000000e+00 : f32
    %159 = vector.broadcast %cst_66 : f32 to vector<2x16xf32>
    %cst_67 = arith.constant dense<0x7F800000> : vector<2xf32>
    %160 = vector.multi_reduction <minimumf>, %152, %cst_67 [1] : vector<2x16xf32> to vector<2xf32>
    %161 = vector.shape_cast %160 : vector<2xf32> to vector<2x1xf32>
    %162 = vector.broadcast %161 : vector<2x1xf32> to vector<2x16xf32>
    %163 = arith.cmpf oeq, %152, %162 : vector<2x16xf32>
    %cst_68 = arith.constant 1.600000e+01 : f32
    %164 = vector.broadcast %cst_68 : f32 to vector<2x16xf32>
    %165 = arith.select %163, %158, %164 : vector<2x16xi1>, vector<2x16xf32>
    %cst_69 = arith.constant dense<0x7F800000> : vector<2xf32>
    %166 = vector.multi_reduction <minimumf>, %165, %cst_69 [1] : vector<2x16xf32> to vector<2xf32>
    %167 = vector.shape_cast %166 : vector<2xf32> to vector<2x1xf32>
    %168 = vector.broadcast %167 : vector<2x1xf32> to vector<2x16xf32>
    %169 = arith.cmpf oeq, %158, %168 : vector<2x16xf32>
    %170 = arith.extui %169 : vector<2x16xi1> to vector<2x16xi32>
    %171 = arith.sitofp %170 : vector<2x16xi32> to vector<2x16xf32>
    %172 = arith.addf %159, %171 : vector<2x16xf32>
    %cst_70 = arith.constant 5.000000e-01 : f32
    %173 = vector.broadcast %cst_70 : f32 to vector<2x16xf32>
    %174 = arith.cmpf ogt, %171, %173 : vector<2x16xf32>
    %cst_71 = arith.constant 1.000000e+30 : f32
    %175 = vector.broadcast %cst_71 : f32 to vector<2x16xf32>
    %176 = arith.select %174, %175, %152 : vector<2x16xi1>, vector<2x16xf32>
    %cst_72 = arith.constant dense<0x7F800000> : vector<2xf32>
    %177 = vector.multi_reduction <minimumf>, %176, %cst_72 [1] : vector<2x16xf32> to vector<2xf32>
    %178 = vector.shape_cast %177 : vector<2xf32> to vector<2x1xf32>
    %179 = vector.broadcast %178 : vector<2x1xf32> to vector<2x16xf32>
    %180 = arith.cmpf oeq, %176, %179 : vector<2x16xf32>
    %cst_73 = arith.constant 1.600000e+01 : f32
    %181 = vector.broadcast %cst_73 : f32 to vector<2x16xf32>
    %182 = arith.select %180, %158, %181 : vector<2x16xi1>, vector<2x16xf32>
    %cst_74 = arith.constant dense<0x7F800000> : vector<2xf32>
    %183 = vector.multi_reduction <minimumf>, %182, %cst_74 [1] : vector<2x16xf32> to vector<2xf32>
    %184 = vector.shape_cast %183 : vector<2xf32> to vector<2x1xf32>
    %185 = vector.broadcast %184 : vector<2x1xf32> to vector<2x16xf32>
    %186 = arith.cmpf oeq, %158, %185 : vector<2x16xf32>
    %187 = arith.extui %186 : vector<2x16xi1> to vector<2x16xi32>
    %188 = arith.sitofp %187 : vector<2x16xi32> to vector<2x16xf32>
    %189 = arith.addf %172, %188 : vector<2x16xf32>
    %cst_75 = arith.constant 5.000000e-01 : f32
    %190 = vector.broadcast %cst_75 : f32 to vector<2x16xf32>
    %191 = arith.cmpf ogt, %188, %190 : vector<2x16xf32>
    %cst_76 = arith.constant 1.000000e+30 : f32
    %192 = vector.broadcast %cst_76 : f32 to vector<2x16xf32>
    %193 = arith.select %191, %192, %176 : vector<2x16xi1>, vector<2x16xf32>
    %cst_77 = arith.constant dense<0x7F800000> : vector<2xf32>
    %194 = vector.multi_reduction <minimumf>, %193, %cst_77 [1] : vector<2x16xf32> to vector<2xf32>
    %195 = vector.shape_cast %194 : vector<2xf32> to vector<2x1xf32>
    %196 = vector.broadcast %195 : vector<2x1xf32> to vector<2x16xf32>
    %197 = arith.cmpf oeq, %193, %196 : vector<2x16xf32>
    %cst_78 = arith.constant 1.600000e+01 : f32
    %198 = vector.broadcast %cst_78 : f32 to vector<2x16xf32>
    %199 = arith.select %197, %158, %198 : vector<2x16xi1>, vector<2x16xf32>
    %cst_79 = arith.constant dense<0x7F800000> : vector<2xf32>
    %200 = vector.multi_reduction <minimumf>, %199, %cst_79 [1] : vector<2x16xf32> to vector<2xf32>
    %201 = vector.shape_cast %200 : vector<2xf32> to vector<2x1xf32>
    %202 = vector.broadcast %201 : vector<2x1xf32> to vector<2x16xf32>
    %203 = arith.cmpf oeq, %158, %202 : vector<2x16xf32>
    %204 = arith.extui %203 : vector<2x16xi1> to vector<2x16xi32>
    %205 = arith.sitofp %204 : vector<2x16xi32> to vector<2x16xf32>
    %206 = arith.addf %189, %205 : vector<2x16xf32>
    %cst_80 = arith.constant 5.000000e-01 : f32
    %207 = vector.broadcast %cst_80 : f32 to vector<2x16xf32>
    %208 = arith.cmpf ogt, %205, %207 : vector<2x16xf32>
    %cst_81 = arith.constant 1.000000e+30 : f32
    %209 = vector.broadcast %cst_81 : f32 to vector<2x16xf32>
    %210 = arith.select %208, %209, %193 : vector<2x16xi1>, vector<2x16xf32>
    %cst_82 = arith.constant dense<0x7F800000> : vector<2xf32>
    %211 = vector.multi_reduction <minimumf>, %210, %cst_82 [1] : vector<2x16xf32> to vector<2xf32>
    %212 = vector.shape_cast %211 : vector<2xf32> to vector<2x1xf32>
    %213 = vector.broadcast %212 : vector<2x1xf32> to vector<2x16xf32>
    %214 = arith.cmpf oeq, %210, %213 : vector<2x16xf32>
    %cst_83 = arith.constant 1.600000e+01 : f32
    %215 = vector.broadcast %cst_83 : f32 to vector<2x16xf32>
    %216 = arith.select %214, %158, %215 : vector<2x16xi1>, vector<2x16xf32>
    %cst_84 = arith.constant dense<0x7F800000> : vector<2xf32>
    %217 = vector.multi_reduction <minimumf>, %216, %cst_84 [1] : vector<2x16xf32> to vector<2xf32>
    %218 = vector.shape_cast %217 : vector<2xf32> to vector<2x1xf32>
    %219 = vector.broadcast %218 : vector<2x1xf32> to vector<2x16xf32>
    %220 = arith.cmpf oeq, %158, %219 : vector<2x16xf32>
    %221 = arith.extui %220 : vector<2x16xi1> to vector<2x16xi32>
    %222 = arith.sitofp %221 : vector<2x16xi32> to vector<2x16xf32>
    %223 = arith.addf %206, %222 : vector<2x16xf32>
    %cst_85 = arith.constant dense<0.000000e+00> : vector<2x32xf32>
    %224 = tpu.matmul %223, %139, %cst_85 {dimension_numbers = #tpu.dot_dimension_numbers<[1], [0], [0], [1], [0, 0, 1, 1], [], []>} : vector<2x16xf32>, vector<16x32xf32>, vector<2x32xf32> -> vector<2x32xf32>
    %cst_86 = arith.constant 2.500000e-01 : f32
    %225 = vector.broadcast %cst_86 : f32 to vector<2x32xf32>
    %226 = arith.mulf %224, %225 : vector<2x32xf32>
    %227 = tpu.concatenate %132, %127, %226 in 1 : vector<2x32xf32>, vector<2x32xf32>, vector<2x32xf32> -> vector<2x96xf32>
    %c0_87 = arith.constant 0 : index
    %c0_88 = arith.constant 0 : index
    %228 = vector.load %arg13[%c0_87, %c0_88] : memref<96x64xf32, #tpu.memory_space<vmem>>, vector<96x64xf32>
    %cst_89 = arith.constant dense<0.000000e+00> : vector<2x64xf32>
    %229 = tpu.matmul %227, %228, %cst_89 {dimension_numbers = #tpu.dot_dimension_numbers<[1], [0], [0], [1], [0, 0, 1, 1], [], []>} : vector<2x96xf32>, vector<96x64xf32>, vector<2x64xf32> -> vector<2x64xf32>
    %c0_90 = arith.constant 0 : index
    %c0_91 = arith.constant 0 : index
    %230 = vector.load %arg14[%c0_90, %c0_91] : memref<1x64xf32, #tpu.memory_space<vmem>>, vector<1x64xf32>
    %231 = vector.broadcast %230 : vector<1x64xf32> to vector<2x64xf32>
    %232 = arith.addf %229, %231 : vector<2x64xf32>
    %cst_92 = arith.constant 0.000000e+00 : f32
    %233 = vector.broadcast %cst_92 : f32 to vector<2x64xf32>
    %234 = arith.maximumf %232, %233 : vector<2x64xf32>
    %c0_93 = arith.constant 0 : index
    %c0_94 = arith.constant 0 : index
    %235 = vector.load %arg15[%c0_93, %c0_94] : memref<64x64xf32, #tpu.memory_space<vmem>>, vector<64x64xf32>
    %cst_95 = arith.constant dense<0.000000e+00> : vector<2x64xf32>
    %236 = tpu.matmul %234, %235, %cst_95 {dimension_numbers = #tpu.dot_dimension_numbers<[1], [0], [0], [1], [0, 0, 1, 1], [], []>} : vector<2x64xf32>, vector<64x64xf32>, vector<2x64xf32> -> vector<2x64xf32>
    %c0_96 = arith.constant 0 : index
    %c0_97 = arith.constant 0 : index
    %237 = vector.load %arg16[%c0_96, %c0_97] : memref<1x64xf32, #tpu.memory_space<vmem>>, vector<1x64xf32>
    %238 = vector.broadcast %237 : vector<1x64xf32> to vector<2x64xf32>
    %239 = arith.addf %236, %238 : vector<2x64xf32>
    %c0_98 = arith.constant 0 : index
    %c0_99 = arith.constant 0 : index
    %240 = vector.load %arg17[%c0_98, %c0_99] : memref<64x32xf32, #tpu.memory_space<vmem>>, vector<64x32xf32>
    %cst_100 = arith.constant dense<0.000000e+00> : vector<2x32xf32>
    %241 = tpu.matmul %239, %240, %cst_100 {dimension_numbers = #tpu.dot_dimension_numbers<[1], [0], [0], [1], [0, 0, 1, 1], [], []>} : vector<2x64xf32>, vector<64x32xf32>, vector<2x32xf32> -> vector<2x32xf32>
    %c0_101 = arith.constant 0 : index
    %c0_102 = arith.constant 0 : index
    %242 = vector.load %arg18[%c0_101, %c0_102] : memref<1x32xf32, #tpu.memory_space<vmem>>, vector<1x32xf32>
    %243 = vector.broadcast %242 : vector<1x32xf32> to vector<2x32xf32>
    %244 = arith.addf %241, %243 : vector<2x32xf32>
    %cst_103 = arith.constant 0.000000e+00 : f32
    %245 = vector.broadcast %cst_103 : f32 to vector<2x32xf32>
    %246 = arith.maximumf %244, %245 : vector<2x32xf32>
    %c0_104 = arith.constant 0 : index
    %c0_105 = arith.constant 0 : index
    %247 = vector.load %arg19[%c0_104, %c0_105] : memref<32x32xf32, #tpu.memory_space<vmem>>, vector<32x32xf32>
    %cst_106 = arith.constant dense<0.000000e+00> : vector<2x32xf32>
    %248 = tpu.matmul %246, %247, %cst_106 {dimension_numbers = #tpu.dot_dimension_numbers<[1], [0], [0], [1], [0, 0, 1, 1], [], []>} : vector<2x32xf32>, vector<32x32xf32>, vector<2x32xf32> -> vector<2x32xf32>
    %c0_107 = arith.constant 0 : index
    %c0_108 = arith.constant 0 : index
    %249 = vector.load %arg20[%c0_107, %c0_108] : memref<1x32xf32, #tpu.memory_space<vmem>>, vector<1x32xf32>
    %250 = vector.broadcast %249 : vector<1x32xf32> to vector<2x32xf32>
    %251 = arith.addf %248, %250 : vector<2x32xf32>
    %c0_109 = arith.constant 0 : index
    %c0_110 = arith.constant 0 : index
    %252 = vector.load %arg21[%c0_109, %c0_110] : memref<2x32xf32, #tpu.memory_space<vmem>>, vector<2x32xf32>
    tpu.vector_store %arg21[%c0_109, %c0_110], %251 {strides = array<i32>} : memref<2x32xf32, #tpu.memory_space<vmem>>, vector<2x32xf32>,
    return
  }
  func.func @transform_0(%arg0: i32, %arg1: memref<2x8xi32, #tpu.memory_space<smem>>) -> (i32, i32) {
    %c0_i32 = arith.constant 0 : i32
    %c0_i32_0 = arith.constant 0 : i32
    %c0_i32_1 = arith.constant 0 : i32
    return %c0_i32, %c0_i32_0 : i32, i32
  }
  func.func @transform_1(%arg0: i32, %arg1: memref<2x8xi32, #tpu.memory_space<smem>>) -> (i32, i32) {
    %c0_i32 = arith.constant 0 : i32
    %c0_i32_0 = arith.constant 0 : i32
    %c0_i32_1 = arith.constant 0 : i32
    return %c0_i32, %c0_i32_0 : i32, i32
  }
  func.func @transform_2(%arg0: i32, %arg1: memref<2x8xi32, #tpu.memory_space<smem>>) -> (i32, i32) {
    %c0_i32 = arith.constant 0 : i32
    %c0_i32_0 = arith.constant 0 : i32
    %c0_i32_1 = arith.constant 0 : i32
    return %c0_i32, %c0_i32_0 : i32, i32
  }
  func.func @transform_3(%arg0: i32, %arg1: memref<2x8xi32, #tpu.memory_space<smem>>) -> (i32, i32) {
    %c0_i32 = arith.constant 0 : i32
    %c0_i32_0 = arith.constant 0 : i32
    %c0_i32_1 = arith.constant 0 : i32
    return %c0_i32, %c0_i32_0 : i32, i32
  }
  func.func @transform_4(%arg0: i32, %arg1: memref<2x8xi32, #tpu.memory_space<smem>>) -> (i32, i32) {
    %c0_i32 = arith.constant 0 : i32
    %c0_i32_0 = arith.constant 0 : i32
    %c0_i32_1 = arith.constant 0 : i32
    return %c0_i32, %c0_i32_0 : i32, i32
  }
  func.func @transform_5(%arg0: i32, %arg1: memref<2x8xi32, #tpu.memory_space<smem>>) -> (i32, i32) {
    %c0_i32 = arith.constant 0 : i32
    %c0_i32_0 = arith.constant 0 : i32
    %c0_i32_1 = arith.constant 0 : i32
    return %c0_i32, %c0_i32_0 : i32, i32
  }
  func.func @transform_6(%arg0: i32, %arg1: memref<2x8xi32, #tpu.memory_space<smem>>) -> (i32, i32) {
    %c0_i32 = arith.constant 0 : i32
    %c0_i32_0 = arith.constant 0 : i32
    %c0_i32_1 = arith.constant 0 : i32
    return %c0_i32, %c0_i32_0 : i32, i32
  }
  func.func @transform_7(%arg0: i32, %arg1: memref<2x8xi32, #tpu.memory_space<smem>>) -> (i32, i32) {
    %c0_i32 = arith.constant 0 : i32
    %c0_i32_0 = arith.constant 0 : i32
    %c0_i32_1 = arith.constant 0 : i32
    return %c0_i32, %c0_i32_0 : i32, i32
  }
  func.func @transform_8(%arg0: i32, %arg1: memref<2x8xi32, #tpu.memory_space<smem>>) -> (i32, i32) {
    %c0_i32 = arith.constant 0 : i32
    %c0_i32_0 = arith.constant 0 : i32
    %c0_i32_1 = arith.constant 0 : i32
    return %c0_i32, %c0_i32_0 : i32, i32
  }
  func.func @transform_9(%arg0: i32, %arg1: memref<2x8xi32, #tpu.memory_space<smem>>) -> (i32, i32) {
    %c0_i32 = arith.constant 0 : i32
    %c0_i32_0 = arith.constant 0 : i32
    %c0_i32_1 = arith.constant 0 : i32
    return %c0_i32, %c0_i32_0 : i32, i32
  }
  func.func @transform_10(%arg0: i32, %arg1: memref<2x8xi32, #tpu.memory_space<smem>>) -> (i32, i32) {
    %c0_i32 = arith.constant 0 : i32
    %c0_i32_0 = arith.constant 0 : i32
    %c0_i32_1 = arith.constant 0 : i32
    return %c0_i32, %c0_i32_0 : i32, i32
  }
  func.func @transform_11(%arg0: i32, %arg1: memref<2x8xi32, #tpu.memory_space<smem>>) -> (i32, i32) {
    %c0_i32 = arith.constant 0 : i32
    %c0_i32_0 = arith.constant 0 : i32
    %c0_i32_1 = arith.constant 0 : i32
    return %c0_i32, %c0_i32_0 : i32, i32
  }
  func.func @transform_12(%arg0: i32, %arg1: memref<2x8xi32, #tpu.memory_space<smem>>) -> (i32, i32) {
    %c0_i32 = arith.constant 0 : i32
    %c0_i32_0 = arith.constant 0 : i32
    %c0_i32_1 = arith.constant 0 : i32
    return %c0_i32, %c0_i32_0 : i32, i32
  }
  func.func @transform_13(%arg0: i32, %arg1: memref<2x8xi32, #tpu.memory_space<smem>>) -> (i32, i32) {
    %c0_i32 = arith.constant 0 : i32
    %c0_i32_0 = arith.constant 0 : i32
    %c0_i32_1 = arith.constant 0 : i32
    return %c0_i32, %c0_i32_0 : i32, i32
  }
  func.func @transform_14(%arg0: i32, %arg1: memref<2x8xi32, #tpu.memory_space<smem>>) -> (i32, i32) {
    %c0_i32 = arith.constant 0 : i32
    %c0_i32_0 = arith.constant 0 : i32
    %c0_i32_1 = arith.constant 0 : i32
    return %c0_i32, %c0_i32_0 : i32, i32
  }
  func.func @transform_15(%arg0: i32, %arg1: memref<2x8xi32, #tpu.memory_space<smem>>) -> (i32, i32) {
    %c0_i32 = arith.constant 0 : i32
    %c0_i32_0 = arith.constant 0 : i32
    %c0_i32_1 = arith.constant 0 : i32
    return %c0_i32, %c0_i32_0 : i32, i32
  }
  func.func @transform_16(%arg0: i32, %arg1: memref<2x8xi32, #tpu.memory_space<smem>>) -> (i32, i32) {
    %c0_i32 = arith.constant 0 : i32
    %c0_i32_0 = arith.constant 0 : i32
    %c0_i32_1 = arith.constant 0 : i32
    return %c0_i32, %c0_i32_0 : i32, i32
  }
  func.func @transform_17(%arg0: i32, %arg1: memref<2x8xi32, #tpu.memory_space<smem>>) -> (i32, i32) {
    %c0_i32 = arith.constant 0 : i32
    %c0_i32_0 = arith.constant 0 : i32
    %c0_i32_1 = arith.constant 0 : i32
    return %c0_i32, %c0_i32_0 : i32, i32
  }
  func.func @transform_18(%arg0: i32, %arg1: memref<2x8xi32, #tpu.memory_space<smem>>) -> (i32, i32) {
    %c0_i32 = arith.constant 0 : i32
    %c0_i32_0 = arith.constant 0 : i32
    %c0_i32_1 = arith.constant 0 : i32
    return %c0_i32, %c0_i32_0 : i32, i32
  }
  func.func @transform_19(%arg0: i32, %arg1: memref<2x8xi32, #tpu.memory_space<smem>>) -> (i32, i32) {
    %c0_i32 = arith.constant 0 : i32
    %c0_i32_0 = arith.constant 0 : i32
    %c0_i32_1 = arith.constant 0 : i32
    return %c0_i32, %c0_i32_0 : i32, i32
  }
  func.func @transform_20(%arg0: i32, %arg1: memref<2x8xi32, #tpu.memory_space<smem>>) -> (i32, i32) {
    %c0_i32 = arith.constant 0 : i32
    %c0_i32_0 = arith.constant 0 : i32
    %c0_i32_1 = arith.constant 0 : i32
    return %c0_i32, %c0_i32_0 : i32, i32
  }
}

</mosaic_0001>

<bundles_post_ra>
// kernel: vlmrag_forward.1
= control target key start
LH: loop header
LB: loop body
LE: loop exit
PB: predicated region body
PF: predicated region fallthrough
CT: control target
= control target key end

     0   :  { %s3635_s0 = inlined_call_operand.vmem [shape: s32[2,8], index: 0, kind: input, shape index: {}]   ;;  %s3636_s1 = inlined_call_operand.vmem [shape: f32[512,36], index: 1, kind: input, shape index: {}]   ;;  %s3637_s2 = inlined_call_operand.vmem [shape: f32[36,8], index: 2, kind: input, shape index: {}]   ;;  %s3638_s3 = inlined_call_operand.vmem [shape: f32[1,8], index: 3, kind: input, shape index: {}]   ;;  %s3639_s4 = inlined_call_operand.vmem [shape: f32[32,32], index: 4, kind: input, shape index: {}]   ;;  %s3640_s5 = inlined_call_operand.vmem [shape: f32[8,32], index: 5, kind: input, shape index: {}]   ;;  %s3641_s6 = inlined_call_operand.vmem [shape: f32[1,32], index: 6, kind: input, shape index: {}]   ;;  %s3642_s7 = inlined_call_operand.vmem [shape: f32[32,32], index: 7, kind: input, shape index: {}]   ;;  %s3643_s8 = inlined_call_operand.vmem [shape: f32[1,32], index: 8, kind: input, shape index: {}]   ;;  %s3644_s9 = inlined_call_operand.vmem [shape: f32[64,32], index: 9, kind: input, shape index: {}]   ;;  %s3645_s10 = inlined_call_operand.vmem [shape: f32[1,32], index: 10, kind: input, shape index: {}]   ;;  %s3646_s11 = inlined_call_operand.vmem [shape: f32[16,32], index: 11, kind: input, shape index: {}]   ;;  %s3647_s12 = inlined_call_operand.vmem [shape: f32[96,64], index: 12, kind: input, shape index: {}]   ;;  %s3648_s13 = inlined_call_operand.vmem [shape: f32[1,64], index: 13, kind: input, shape index: {}]   ;;  %s3649_s14 = inlined_call_operand.vmem [shape: f32[64,64], index: 14, kind: input, shape index: {}]   ;;  %s3650_s15 = inlined_call_operand.vmem [shape: f32[1,64], index: 15, kind: input, shape index: {}]   ;;  %s3651_s16 = inlined_call_operand.vmem [shape: f32[64,32], index: 16, kind: input, shape index: {}]   ;;  %s3652_s17 = inlined_call_operand.vmem [shape: f32[1,32], index: 17, kind: input, shape index: {}]   ;;  %s3653_s18 = inlined_call_operand.vmem [shape: f32[32,32], index: 18, kind: input, shape index: {}]   ;;  %s3654_s19 = inlined_call_operand.vmem [shape: f32[1,32], index: 19, kind: input, shape index: {}]   ;;  %s3655_s20 = inlined_call_operand.hbm [shape: f32[2,32], index: 20, kind: output, shape index: {0}]   ;;  %s3656_s21 = inlined_call_operand.hbm [shape: f32[2,16], index: 21, kind: output, shape index: {1}]  }
   0x1   :  { %3660 = sst [smem:[#allocation11_spill]] %s3635_s0 }
   0x2   :  { %3661 = sst [smem:[#allocation12_spill]] %s3636_s1  ;;  %s3667_s26 = sld [smem:[#allocation11_spill]] }
   0x3   :  { %3662 = sst [smem:[#allocation13_spill]] %s3637_s2 }
   0x4   :  { %3663 = sst [smem:[#allocation14_spill]] %s3638_s3 }
   0x5   :  { %3664 = sst [smem:[#allocation15_spill]] %s3639_s4 }
   0x6   :  { %3665 = sst [smem:[#allocation16_spill]] %s3640_s5 }
   0x7   :  { %3666 = sst [smem:[#allocation17_spill]] %s3650_s15 }
   0x8   :  { %s27_s15 = sshll.u32 %s3667_s26, 4  ;;  %s28_s15 = int_to_ptr.vmem [resolvable:$true] %s27_s15 }
   0x9   :  { %s2688_s27 = scalar_lea.vmem %s28_s15, 32  ;;  %p2693_p1 = scmp.lt.s32.totalorder %s28_s15, %s28_s15 }
   0xa   :  { %p2689_p0 = scmp.ne.s32.totalorder %s28_s15, %s2688_s27  ;;  %p2694_p2 = scmp.lt.s32.totalorder %s2688_s27, %s2688_s27 }
   0xc   :  { %p2695_p3 = por %p2694_p2, %p2693_p1 }
   0xe   :  { %p2696_p4 = pnand %p2695_p3, %p2689_p0 }
  0x10   :  { %2699 = shalt.err (!%p2696_p4)  }
  0x11   :  { %s2750_s3 = smov [#allocation3]  }
  0x12   :  { %30 = dma.vmem_to_smem %s28_s15, 32, %s2750_s3, [#allocation2] }
  0x13   :  { %2744 = dma.done.wait [#allocation2], 32 }
  0x14   :  { %2745 = vsyncadd [#allocation2], 4294967264 }
  0x15   :  { %32 = sfence }
  0x16   :  { %33 = vsyncpa [#allocation5], 0  ;;  %s3668_s0 = sld [smem:[#allocation13_spill]]  ;;  %vm149_vm0 = vcmask 293888   ;;  %s3669_s2 = sld [smem:[#allocation12_spill]]  ;;  %vm342_vm1 = vcmask 1043456  }
  0x1c   :  { %v137_v0 = vld [vmem:[%s3668_s0] sm:$0xff]  ;;  %v138_v1 = vld [vmem:[%s3668_s0 + $0x8] sm:$0xff]  ;;  %v139_v2 = vld [vmem:[%s3668_s0 + $0x10] sm:$0xff] }
  0x1d   :  { %v2586_v3 = vpack.c.bf16 %v138_v1, %v137_v0  ;;  %v140_v4 = vld [vmem:[%s3668_s0 + $0x18] sm:$0xff]  ;;  %v73_v5 = vld [vmem:[%s3669_s2] sm:$0xff]  ;;  %v74_v8 = vld [vmem:[%s3669_s2 + $0x8] sm:$0xff] }
  0x1e   :  { %v2590_v6 = vpack.c.bf16 %v140_v4, %v139_v2  ;;  %2347 = vmatprep.mubr.msk.f32.mxu0 %vm149_vm0, %v73_v5  ;;  %v141_v7 = vld [vmem:[%s3668_s0 + $0x20] sm:$0xf]  ;;  %v75_v9 = vld [vmem:[%s3669_s2 + $0x10] sm:$0xff]  ;;  %v76_v10 = vld [vmem:[%s3669_s2 + $0x18] sm:$0xff] }
  0x1f   :  { %2587 = vmatprep.subr.bf16.mxu0 %v2586_v3  ;;  %v77_v11 = vld [vmem:[%s3669_s2 + $0x20] sm:$0xff]  ;;  %v78_v12 = vld [vmem:[%s3669_s2 + $0x28] sm:$0xff]  ;;  %v79_v13 = vld [vmem:[%s3669_s2 + $0x30] sm:$0xff] }
  0x20   :  { %2589 = vmatpush3.bf16.msra.mxu0 %v2586_v3  ;;  %v80_v14 = vld [vmem:[%s3669_s2 + $0x38] sm:$0xff]  ;;  %v81_v15 = vld [vmem:[%s3669_s2 + $0x40] sm:$0xff] }
  0x21   :  { %2591 = vmatprep.subr.bf16.mxu0 %v2590_v6 }
  0x24   :  { %2593 = vmatpush3.bf16.msra.mxu0 %v2590_v6 }
  0x25   :  { %2345 = vmatprep.subr.msk.mxu0 %vm342_vm1, %v141_v7 }
  0x28   :  { %2346 = vmatpush3.msk.msra.mxu0 %vm342_vm1, %v141_v7 }
  0x29   :  { %2348 = vmatmul.mubr.msk.f32.vlgmr.msra.gmra.mrb[0].mxu0 %vm149_vm0, %v74_v8 }
  0x2a   :  { %2350 = vmatprep.mubr.msk.f32.mxu0 %vm149_vm0, %v75_v9 }
  0x2d   :  { %2351 = vmatmul.mubr.msk.f32.gmra.mrb[2].mxu0 %vm149_vm0, %v76_v10 }
  0x2e   :  { %2353 = vmatprep.mubr.msk.f32.mxu0 %vm149_vm0, %v77_v11 }
  0x31   :  { %2354 = vmatmul.mubr.msk.f32.gmra.mrb[4].mxu0 %vm149_vm0, %v78_v12 }
  0x32   :  { %2356 = vmatprep.mubr.msk.f32.mxu0 %vm149_vm0, %v79_v13 }
  0x33   :  { %34 = vsyncpa [#allocation7], 0  ;;  %v82_v16 = vld [vmem:[%s3669_s2 + $0x48] sm:$0xff]  ;;  %v83_v17 = vld [vmem:[%s3669_s2 + $0x50] sm:$0xff]  ;;  %s941_s23 = sld [smem:[#allocation3]]  ;;  %s2146_s15 = sld [smem:[#allocation3 + $0x1]]  ;;  %v939_v2 = vlaneseq }
  0x34   :  { %v84_v18 = vld [vmem:[%s3669_s2 + $0x58] sm:$0xff]  ;;  %v85_v19 = vld [vmem:[%s3669_s2 + $0x60] sm:$0xff]  ;;  %v86_v20 = vld [vmem:[%s3669_s2 + $0x68] sm:$0xff]  ;;  %s2160_s25 = sld [smem:[#allocation3 + $0x80]]  ;;  %s3121_s26 = sld [smem:[#allocation3 + $0x81]]  ;;  %v2751_v10 = vmov 0.0  }
  0x35   :  { %2357 = vmatmul.mubr.msk.f32.gmra.mrb[6].mxu0 %vm149_vm0, %v80_v14  ;;  %v87_v21 = vld [vmem:[%s3669_s2 + $0x70] sm:$0xff]  ;;  %v88_v22 = vld [vmem:[%s3669_s2 + $0x78] sm:$0xff]  ;;  %v89_v23 = vld [vmem:[%s3669_s2 + $0x80] sm:$0xff]  ;;  %s2148_s27 = sld [smem:[#allocation3 + $0x2]]  ;;  %s3130_s4 = sld [smem:[#allocation3 + $0x3]]  ;;  %v3136_v5 = vand.u32 127, %v939_v2 }
  0x36   :  { %2359 = vmatprep.mubr.msk.f32.mxu0 %vm149_vm0, %v81_v15  ;;  %v90_v24 = vld [vmem:[%s3669_s2 + $0x88] sm:$0xff]  ;;  %v91_v25 = vld [vmem:[%s3669_s2 + $0x90] sm:$0xff]  ;;  %v92_v26 = vld [vmem:[%s3669_s2 + $0x98] sm:$0xff]  ;;  %s3123_s3 = sld [smem:[#allocation3 + $0x82]]  ;;  %s3138_s5 = sld [smem:[#allocation3 + $0x83]] }
  0x37   :  { %v93_v27 = vld [vmem:[%s3669_s2 + $0xa0] sm:$0xff]  ;;  %v94_v28 = vld [vmem:[%s3669_s2 + $0xa8] sm:$0xff]  ;;  %v95_v29 = vld [vmem:[%s3669_s2 + $0xb0] sm:$0xff]  ;;  %s3140_s22 = sld [smem:[#allocation3 + $0x4]]  ;;  %s3671_s30 = sld [smem:[#allocation14_spill]] }
  0x38   :  { %v96_v30 = vld [vmem:[%s3669_s2 + $0xb8] sm:$0xff]  ;;  %v97_v31 = vld [vmem:[%s3669_s2 + $0xc0] sm:$0xff]  ;;  %v98_v32 = vld [vmem:[%s3669_s2 + $0xc8] sm:$0xff]  ;;  %s3142_s1 = sld [smem:[#allocation3 + $0x84]] }
  0x39   :  { %2360 = vmatmul.mubr.msk.f32.gmra.mrb[8].mxu0 %vm149_vm0, %v82_v16  ;;  %v99_v33 = vld [vmem:[%s3669_s2 + $0xd0] sm:$0xff]  ;;  %v100_v34 = vld [vmem:[%s3669_s2 + $0xd8] sm:$0xff]  ;;  %v101_v35 = vld [vmem:[%s3669_s2 + $0xe0] sm:$0xff]  ;;  %v942_v6 = vstv %s941_s23  ;;  %s3153_s23 = sld [smem:[#allocation3 + $0x5]]  ;;  %s3670_s28 = sld [smem:[#allocation15_spill]] }
  0x3a   :  { %2362 = vmatprep.mubr.msk.f32.mxu0 %vm149_vm0, %v83_v17  ;;  %v102_v36 = vld [vmem:[%s3669_s2 + $0xe8] sm:$0xff]  ;;  %v103_v37 = vld [vmem:[%s3669_s2 + $0xf0] sm:$0xff]  ;;  %v104_v38 = vld [vmem:[%s3669_s2 + $0xf8] sm:$0xff]  ;;  %v948_v7 = vstv %s2146_s15  ;;  %vm943_vm2 = vcmp.eq.s32.totalorder %v3136_v5, %v942_v6 }
  0x3b   :  { %v105_v39 = vld [vmem:[%s3669_s2 + $0x100] sm:$0xff]  ;;  %v106_v40 = vld [vmem:[%s3669_s2 + $0x108] sm:$0xff]  ;;  %v107_v41 = vld [vmem:[%s3669_s2 + $0x110] sm:$0xff]  ;;  %vm949_vm3 = vcmp.eq.s32.totalorder %v3136_v5, %v948_v7  ;;  %v990_v8 = vstv %s2160_s25  ;;  %v2145_v11 = vsel %vm943_vm2, 1.0, %v2751_v10  ;;  %s3164_s25 = sld [smem:[#allocation3 + $0x6]]  ;;  %vm2753_vm2 = vmmov 0  }
  0x3c   :  { %v108_v42 = vld [vmem:[%s3669_s2 + $0x118] sm:$0xff]  ;;  %v109_v43 = vld [vmem:[%s3669_s2 + $0x120] sm:$0xff]  ;;  %v110_v44 = vld [vmem:[%s3669_s2 + $0x128] sm:$0xff]  ;;  %v2147_v12 = vsel %vm949_vm3, 1.0, %v2751_v10  ;;  %v954_v13 = vstv %s2148_s27  ;;  %vm991_vm4 = vcmp.eq.s32.totalorder %v3136_v5, %v990_v8  ;;  %s3168_s27 = sld [smem:[#allocation3 + $0x85]]  ;;  %2451 = vmatprep.mubr.msk.f32.mxu1 %vm2753_vm2, %v2751_v10  ;;  %vm937_vm3 = vcmask 1040384  }
  0x3d   :  { %2363 = vmatmul.mubr.msk.f32.gmra.mrb[10].mxu0 %vm149_vm0, %v84_v18  ;;  %v111_v45 = vld [vmem:[%s3669_s2 + $0x130] sm:$0xff]  ;;  %v112_v46 = vld [vmem:[%s3669_s2 + $0x138] sm:$0xff]  ;;  %v113_v47 = vld [vmem:[%s3669_s2 + $0x140] sm:$0xff]  ;;  %v952_v15 = vadd.f32 %v2147_v12, %v2145_v11  ;;  %vm955_vm5 = vcmp.eq.s32.totalorder %v3136_v5, %v954_v13  ;;  %v2161_v16 = vsel %vm991_vm4, 1.0, %v2751_v10  ;;  %v996_v17 = vstv %s3121_s26  ;;  %s3177_s26 = sld [smem:[#allocation3 + $0x86]] }
  0x3e   :  { %2365 = vmatprep.mubr.msk.f32.mxu0 %vm149_vm0, %v85_v19  ;;  %v114_v48 = vld [vmem:[%s3669_s2 + $0x148] sm:$0xff]  ;;  %v115_v49 = vld [vmem:[%s3669_s2 + $0x150] sm:$0xff]  ;;  %v116_v50 = vld [vmem:[%s3669_s2 + $0x158] sm:$0xff]  ;;  %v2149_v18 = vsel %vm955_vm5, 1.0, %v2751_v10  ;;  %v960_v19 = vstv %s3130_s4  ;;  %vm997_vm6 = vcmp.eq.s32.totalorder %v3136_v5, %v996_v17  ;;  %vm1042_vm4 = vcmask 261120  }
  0x3f   :  { %v117_v51 = vld [vmem:[%s3669_s2 + $0x160] sm:$0xff]  ;;  %v118_v52 = vld [vmem:[%s3669_s2 + $0x168] sm:$0xff]  ;;  %v119_v53 = vld [vmem:[%s3669_s2 + $0x170] sm:$0xff]  ;;  %vm961_vm7 = vcmp.eq.s32.totalorder %v3136_v5, %v960_v19  ;;  %vm795_vm5 = vcmask 64512  }
  0x40   :  { %v120_v54 = vld [vmem:[%s3669_s2 + $0x178] sm:$0xff]  ;;  %v121_v55 = vld [vmem:[%s3669_s2 + $0x180] sm:$0xff]  ;;  %v122_v56 = vld [vmem:[%s3669_s2 + $0x188] sm:$0xff] }
  0x41   :  { %2366 = vmatmul.mubr.msk.f32.gmra.mrb[12].mxu0 %vm149_vm0, %v86_v20  ;;  %v123_v57 = vld [vmem:[%s3669_s2 + $0x190] sm:$0xff]  ;;  %v124_v58 = vld [vmem:[%s3669_s2 + $0x198] sm:$0xff]  ;;  %v125_v59 = vld [vmem:[%s3669_s2 + $0x1a0] sm:$0xff]  ;;  %v1002_v20 = vstv %s3123_s3  ;;  %s3182_s3 = sld [smem:[#allocation3 + $0x7]] }
  0x42   :  { %2368 = vmatprep.mubr.msk.f32.mxu0 %vm149_vm0, %v87_v21  ;;  %v126_v60 = vld [vmem:[%s3669_s2 + $0x1a8] sm:$0xff]  ;;  %v127_v61 = vld [vmem:[%s3669_s2 + $0x1b0] sm:$0xff]  ;;  %v128_v62 = vld [vmem:[%s3669_s2 + $0x1b8] sm:$0xff]  ;;  %vm1003_vm8 = vcmp.eq.s32.totalorder %v3136_v5, %v1002_v20 }
  0x43   :  { %v129_v63 = vld [vmem:[%s3669_s2 + $0x1c0] sm:$0xff]  ;;  %v130_v0 = vld [vmem:[%s3669_s2 + $0x1c8] sm:$0xff]  ;;  %v131_v1 = vld [vmem:[%s3669_s2 + $0x1d0] sm:$0xff] }
  0x44   :  { %v132_v3 = vld [vmem:[%s3669_s2 + $0x1d8] sm:$0xff]  ;;  %v133_v4 = vld [vmem:[%s3669_s2 + $0x1e0] sm:$0xff]  ;;  %v134_v9 = vld [vmem:[%s3669_s2 + $0x1e8] sm:$0xff] }
  0x45   :  { %2369 = vmatmul.mubr.msk.f32.gmra.mrb[14].mxu0 %vm149_vm0, %v88_v22  ;;  %v135_v14 = vld [vmem:[%s3669_s2 + $0x1f0] sm:$0xff]  ;;  %v136_v21 = vld [vmem:[%s3669_s2 + $0x1f8] sm:$0xff]  ;;  %v958_v22 = vadd.f32 %v2149_v18, %v952_v15  ;;  %s3185_s2 = sld [smem:[#allocation3 + $0x87]] }
  0x46   :  { %2371 = vmatprep.mubr.msk.f32.mxu0 %vm149_vm0, %v89_v23  ;;  %v2163_v23 = vsel %vm997_vm6, 1.0, %v2751_v10  ;;  %vm1302_vm6 = vcmask 523264  }
  0x49   :  { %2372 = vmatmul.mubr.msk.f32.gmra.mrb[16].mxu0 %vm149_vm0, %v90_v24  ;;  %v2151_v24 = vsel %vm961_vm7, 1.0, %v2751_v10  ;;  %vm2620_vm7 = vmpackc.low %vm1042_vm4, %vm1042_vm4 }
  0x4a   :  { %2374 = vmatprep.mubr.msk.f32.mxu0 %vm149_vm0, %v91_v25  ;;  %v966_v25 = vstv %s3140_s22 }
  0x4b   :  { %vm967_vm9 = vcmp.eq.s32.totalorder %v3136_v5, %v966_v25 }
  0x4d   :  { %2375 = vmatmul.mubr.msk.f32.gmra.mrb[18].mxu0 %vm149_vm0, %v92_v26  ;;  %v1000_v26 = vadd.f32 %v2163_v23, %v2161_v16 }
  0x4e   :  { %2377 = vmatprep.mubr.msk.f32.mxu0 %vm149_vm0, %v93_v27  ;;  %v2165_v27 = vsel %vm1003_vm8, 1.0, %v2751_v10  ;;  %vm1379_vm8 = vcmask 254976  }
  0x51   :  { %2378 = vmatmul.mubr.msk.f32.gmra.mrb[20].mxu0 %vm149_vm0, %v94_v28  ;;  %v964_v28 = vadd.f32 %v2151_v24, %v958_v22 }
  0x52   :  { %2380 = vmatprep.mubr.msk.f32.mxu0 %vm149_vm0, %v95_v29  ;;  %v1008_v29 = vstv %s3138_s5 }
  0x53   :  { %vm1009_vm10 = vcmp.eq.s32.totalorder %v3136_v5, %v1008_v29 }
  0x55   :  { %2381 = vmatmul.mubr.msk.f32.gmra.mrb[22].mxu0 %vm149_vm0, %v96_v30  ;;  %v1014_v30 = vstv %s3142_s1  ;;  %s2754_s1 = smov 32  }
  0x56   :  { %2383 = vmatprep.mubr.msk.f32.mxu0 %vm149_vm0, %v97_v31  ;;  %v1038_v31 = vld [vmem:[%s3670_s28] sm:$0xff]  ;;  %vm1015_vm12 = vcmp.eq.s32.totalorder %v3136_v5, %v1014_v30 }
  0x59   :  { %2384 = vmatmul.mubr.msk.f32.gmra.mrb[24].mxu0 %vm149_vm0, %v98_v32  ;;  %v1039_v32 = vld [vmem:[%s3670_s28 + $0x8] sm:$0xff] }
  0x5a   :  { %2386 = vmatprep.mubr.msk.f32.mxu0 %vm149_vm0, %v99_v33  ;;  %v2153_v33 = vsel %vm967_vm9, 1.0, %v2751_v10  ;;  %vm1558_vm9 = vcmask 123904  }
  0x5d   :  { %2387 = vmatmul.mubr.msk.f32.gmra.mrb[26].mxu0 %vm149_vm0, %v100_v34  ;;  %v972_v34 = vstv %s3153_s23 }
  0x5e   :  { %2389 = vmatprep.mubr.msk.f32.mxu0 %vm149_vm0, %v101_v35  ;;  %v1006_v35 = vadd.f32 %v2165_v27, %v1000_v26  ;;  %vm973_vm11 = vcmp.eq.s32.totalorder %v3136_v5, %v972_v34 }
  0x61   :  { %2390 = vmatmul.mubr.msk.f32.gmra.mrb[28].mxu0 %vm149_vm0, %v102_v36  ;;  %v2595_v36 = vpack.c.bf16 %v1039_v32, %v1038_v31 }
  0x62   :  { %2392 = vmatprep.mubr.msk.f32.mxu0 %vm149_vm0, %v103_v37  ;;  %v970_v37 = vadd.f32 %v2153_v33, %v964_v28 }
  0x65   :  { %2393 = vmatmul.mubr.msk.f32.gmra.mrb[30].mxu0 %vm149_vm0, %v104_v38  ;;  %v2752_v38 = vmov 0.0|0.0  }
  0x66   :  { %2395 = vmatprep.mubr.msk.f32.mxu0 %vm149_vm0, %v105_v39  ;;  %2594 = vmatprep.subr.bf16.mxu1 %v2752_v38  ;;  %v2155_v39 = vsel %vm973_vm11, 1.0, %v2751_v10 }
  0x67   :  { %2596 = vmatpush3.bf16.msra.mxu1 %v2595_v36 }
  0x68   :  { %2597 = vmatprep.subr.bf16.mxu1 %v2752_v38 }
  0x69   :  { %2396 = vmatmul.mubr.msk.f32.gmra.mrb[32].mxu0 %vm149_vm0, %v106_v40  ;;  %v978_v40 = vstv %s3164_s25 }
  0x6a   :  { %2398 = vmatprep.mubr.msk.f32.mxu0 %vm149_vm0, %v107_v41  ;;  %v2167_v41 = vsel %vm1009_vm10, 1.0, %v2751_v10  ;;  %vm979_vm13 = vcmp.eq.s32.totalorder %v3136_v5, %v978_v40 }
  0x6d   :  { %2399 = vmatmul.mubr.msk.f32.gmra.mrb[34].mxu0 %vm149_vm0, %v108_v42  ;;  %v976_v42 = vadd.f32 %v2155_v39, %v970_v37 }
  0x6e   :  { %2401 = vmatprep.mubr.msk.f32.mxu0 %vm149_vm0, %v109_v43  ;;  %v1012_v43 = vadd.f32 %v2167_v41, %v1006_v35 }
  0x71   :  { %2402 = vmatmul.mubr.msk.f32.gmra.mrb[36].mxu0 %vm149_vm0, %v110_v44  ;;  %v2169_v44 = vsel %vm1015_vm12, 1.0, %v2751_v10 }
  0x72   :  { %2404 = vmatprep.mubr.msk.f32.mxu0 %vm149_vm0, %v111_v45  ;;  %v1040_v45 = vld [vmem:[%s3670_s28 + $0x10] sm:$0xff] }
  0x75   :  { %2405 = vmatmul.mubr.msk.f32.gmra.mrb[38].mxu0 %vm149_vm0, %v112_v46  ;;  %v1041_v46 = vld [vmem:[%s3670_s28 + $0x18] sm:$0xff] }
  0x76   :  { %2407 = vmatprep.mubr.msk.f32.mxu0 %vm149_vm0, %v113_v47  ;;  %v2157_v47 = vsel %vm979_vm13, 1.0, %v2751_v10 }
  0x79   :  { %2408 = vmatmul.mubr.msk.f32.gmra.mrb[40].mxu0 %vm149_vm0, %v114_v48  ;;  %v984_v48 = vstv %s3182_s3  ;;  %s3672_s3 = sld [smem:[#allocation16_spill]] }
  0x7a   :  { %2410 = vmatprep.mubr.msk.f32.mxu0 %vm149_vm0, %v115_v49  ;;  %v1020_v49 = vstv %s3168_s27  ;;  %vm985_vm14 = vcmp.eq.s32.totalorder %v3136_v5, %v984_v48  ;;  %s3673_s27 = sld [smem:[#allocation17_spill]] }
  0x7b   :  { %vm1021_vm15 = vcmp.eq.s32.totalorder %v3136_v5, %v1020_v49 }
  0x7d   :  { %2411 = vmatmul.mubr.msk.f32.gmra.mrb[42].mxu0 %vm149_vm0, %v116_v50  ;;  %v2598_v50 = vpack.c.bf16 %v1041_v46, %v1040_v45 }
  0x7e   :  { %2413 = vmatprep.mubr.msk.f32.mxu0 %vm149_vm0, %v117_v51  ;;  %v1018_v51 = vadd.f32 %v2169_v44, %v1012_v43 }
  0x7f   :  { %2599 = vmatpush3.bf16.msra.mxu1 %v2598_v50  ;;  %v1117_v35 = vld [vmem:[%s3672_s3] sm:$0xff] }
  0x80   :  { %2454 = vmatprep.subr.mxu1 %v2751_v10 }
  0x81   :  { %2414 = vmatmul.mubr.msk.f32.gmra.mrb[44].mxu0 %vm149_vm0, %v118_v52  ;;  %v982_v52 = vadd.f32 %v2157_v47, %v976_v42 }
  0x82   :  { %2416 = vmatprep.mubr.msk.f32.mxu0 %vm149_vm0, %v119_v53  ;;  %v1026_v53 = vstv %s3177_s26  ;;  %s2756_s26 = smov 64  }
  0x85   :  { %2417 = vmatmul.mubr.msk.f32.gmra.mrb[46].mxu0 %vm149_vm0, %v120_v54  ;;  %v1032_v54 = vstv %s3185_s2 }
  0x86   :  { %2419 = vmatprep.mubr.msk.f32.mxu0 %vm149_vm0, %v121_v55  ;;  %v2159_v55 = vsel %vm985_vm14, 1.0, %v2751_v10  ;;  %vm1033_vm1 = vcmp.eq.s32.totalorder %v3136_v5, %v1032_v54 }
  0x89   :  { %2420 = vmatmul.mubr.msk.f32.gmra.mrb[48].mxu0 %vm149_vm0, %v122_v56  ;;  %v2171_v56 = vsel %vm1021_vm15, 1.0, %v2751_v10 }
  0x8a   :  { %2422 = vmatprep.mubr.msk.f32.mxu0 %vm149_vm0, %v123_v57  ;;  %v1024_v57 = vadd.f32 %v2171_v56, %v1018_v51 }
  0x8d   :  { %2423 = vmatmul.mubr.msk.f32.gmra.mrb[50].mxu0 %vm149_vm0, %v124_v58 }
  0x8e   :  { %2425 = vmatprep.mubr.msk.f32.mxu0 %vm149_vm0, %v125_v59  ;;  %v2175_v59 = vsel %vm1033_vm1, 1.0, %v2751_v10 }
  0x91   :  { %2426 = vmatmul.mubr.msk.f32.gmra.mrb[52].mxu0 %vm149_vm0, %v126_v60  ;;  %v988_v60 = vadd.f32 %v2159_v55, %v982_v52 }
  0x92   :  { %2428 = vmatprep.mubr.msk.f32.mxu0 %vm149_vm0, %v127_v61 }
  0x95   :  { %2429 = vmatmul.mubr.msk.f32.gmra.mrb[54].mxu0 %vm149_vm0, %v128_v62 }
  0x96   :  { %2431 = vmatprep.mubr.msk.f32.mxu0 %vm149_vm0, %v129_v63 }
  0x99   :  { %2432 = vmatmul.mubr.msk.f32.gmra.mrb[56].mxu0 %vm149_vm0, %v130_v0  ;;  %v3238_v0 = vld [vmem:[%s3671_s30] ss:$0 sm:$0xff] }
  0x9a   :  { %2434 = vmatprep.mubr.msk.f32.mxu0 %vm149_vm0, %v131_v1 }
  0x9d   :  { %2435 = vmatmul.mubr.msk.f32.gmra.mrb[58].mxu0 %vm149_vm0, %v132_v3 }
  0x9e   :  { %2437 = vmatprep.mubr.msk.f32.mxu0 %vm149_vm0, %v133_v4 }
  0xa1   :  { %2438 = vmatmul.mubr.msk.f32.gmra.mrb[60].mxu0 %vm149_vm0, %v134_v9 }
  0xa2   :  { %2440 = vmatprep.mubr.msk.f32.mxu0 %vm149_vm0, %v135_v14 }
  0xa5   :  { %2441 = vmatmul.mubr.msk.f32.gmra.mrb[62].mxu0 %vm149_vm0, %v136_v21  ;;  %vm1027_vm0 = vcmp.eq.s32.totalorder %v3136_v5, %v1026_v53 }
  0xa6   :  { %v2173_v58 = vsel %vm1027_vm0, 1.0, %v2751_v10 }
  0xa7   :  { %v1030_v61 = vadd.f32 %v2173_v58, %v1024_v57 }
  0xa9   :  { %v1036_v62 = vadd.f32 %v2175_v59, %v1030_v61 }
  0xab   :  { %v1037_v63 = vsel %vm937_vm3, %v988_v60, %v1036_v62 }
  0xac   :  { %2452 = vmatmul.mubr.msk.f32.vlgmr.msra.gmra.mrb[0].mxu1 %vm1042_vm4, %v1037_v63 }
  0xad   :  { %2456 = vmatprep.mubr.msk.f32.mxu1 %vm2753_vm2, %v2751_v10  ;;  %2455 = vmatpush3.msra.mxu1 %v1117_v35 }
  0xae   :  { %2600 = vmatprep.subr.bf16.mxu1 %v2752_v38 }
  0xfc   :  { %v2349_v1 = vpop.f32.mrb[0].mxu0 }
  0xfd   :  { %v418_v3 = vadd.f32 %v2349_v1, %v3238_v0  ;;  %v412_v4 = vpop.f32.mrb[1].mxu0 }
  0xfe   :  { %v413_v6 = vadd.f32 %v3238_v0, %v412_v4 }
  0xff   :  { %v732_v7 = vmax.f32 %v418_v3, 0.0 }
 0x100   :  { %v731_v8 = vmax.f32 %v413_v6, 0.0  ;;  %v2352_v9 = vpop.f32.mrb[2].mxu0 }
 0x101   :  { %v797_v11 = vsel %vm795_vm5, %v732_v7, 0.0  ;;  %v428_v12 = vadd.f32 %v2352_v9, %v3238_v0  ;;  %v422_v13 = vpop.f32.mrb[3].mxu0 }
 0x102   :  { %v796_v14 = vsel %vm795_vm5, %v731_v8, 0.0  ;;  %v423_v15 = vadd.f32 %v3238_v0, %v422_v13 }
 0x103   :  { %v798_v16 = vadd.f32 %v797_v11, %v796_v14  ;;  %v734_v17 = vmax.f32 %v428_v12, 0.0 }
 0x104   :  { %v733_v18 = vmax.f32 %v423_v15, 0.0  ;;  %v2355_v19 = vpop.f32.mrb[4].mxu0 }
 0x105   :  { %v438_v20 = vadd.f32 %v2355_v19, %v3238_v0  ;;  %v432_v21 = vpop.f32.mrb[5].mxu0  ;;  %v801_v25 = vsel %vm795_vm5, %v734_v17, 0.0 }
 0x106   :  { %v799_v22 = vsel %vm795_vm5, %v733_v18, 0.0  ;;  %v433_v23 = vadd.f32 %v3238_v0, %v432_v21 }
 0x107   :  { %v800_v24 = vadd.f32 %v799_v22, %v798_v16  ;;  %v736_v26 = vmax.f32 %v438_v20, 0.0 }
 0x108   :  { %v735_v27 = vmax.f32 %v433_v23, 0.0  ;;  %v2358_v28 = vpop.f32.mrb[6].mxu0 }
 0x109   :  { %v802_v29 = vadd.f32 %v801_v25, %v800_v24  ;;  %v448_v30 = vadd.f32 %v2358_v28, %v3238_v0  ;;  %v442_v31 = vpop.f32.mrb[7].mxu0  ;;  %v805_v36 = vsel %vm795_vm5, %v736_v26, 0.0 }
 0x10a   :  { %v803_v32 = vsel %vm795_vm5, %v735_v27, 0.0  ;;  %v443_v33 = vadd.f32 %v3238_v0, %v442_v31 }
 0x10b   :  { %v804_v34 = vadd.f32 %v803_v32, %v802_v29  ;;  %v738_v37 = vmax.f32 %v448_v30, 0.0 }
 0x10c   :  { %v737_v39 = vmax.f32 %v443_v33, 0.0  ;;  %v2361_v40 = vpop.f32.mrb[8].mxu0 }
 0x10d   :  { %v806_v41 = vadd.f32 %v805_v36, %v804_v34  ;;  %v458_v42 = vadd.f32 %v2361_v40, %v3238_v0  ;;  %v452_v43 = vpop.f32.mrb[9].mxu0  ;;  %v809_v47 = vsel %vm795_vm5, %v738_v37, 0.0 }
 0x10e   :  { %v807_v44 = vsel %vm795_vm5, %v737_v39, 0.0  ;;  %v453_v45 = vadd.f32 %v3238_v0, %v452_v43 }
 0x10f   :  { %v808_v46 = vadd.f32 %v807_v44, %v806_v41  ;;  %v740_v48 = vmax.f32 %v458_v42, 0.0 }
 0x110   :  { %v739_v49 = vmax.f32 %v453_v45, 0.0  ;;  %v2364_v50 = vpop.f32.mrb[10].mxu0 }
 0x111   :  { %v810_v51 = vadd.f32 %v809_v47, %v808_v46  ;;  %v468_v52 = vadd.f32 %v2364_v50, %v3238_v0  ;;  %v462_v53 = vpop.f32.mrb[11].mxu0  ;;  %v813_v57 = vsel %vm795_vm5, %v740_v48, 0.0 }
 0x112   :  { %v811_v54 = vsel %vm795_vm5, %v739_v49, 0.0  ;;  %v463_v55 = vadd.f32 %v3238_v0, %v462_v53 }
 0x113   :  { %v812_v56 = vadd.f32 %v811_v54, %v810_v51  ;;  %v742_v58 = vmax.f32 %v468_v52, 0.0 }
 0x114   :  { %v741_v59 = vmax.f32 %v463_v55, 0.0  ;;  %v2367_v60 = vpop.f32.mrb[12].mxu0 }
 0x115   :  { %v814_v61 = vadd.f32 %v813_v57, %v812_v56  ;;  %v478_v62 = vadd.f32 %v2367_v60, %v3238_v0  ;;  %v472_v63 = vpop.f32.mrb[13].mxu0  ;;  %v817_v6 = vsel %vm795_vm5, %v742_v58, 0.0 }
 0x116   :  { %v815_v1 = vsel %vm795_vm5, %v741_v59, 0.0  ;;  %v473_v3 = vadd.f32 %v3238_v0, %v472_v63 }
 0x117   :  { %v816_v4 = vadd.f32 %v815_v1, %v814_v61  ;;  %v744_v7 = vmax.f32 %v478_v62, 0.0 }
 0x118   :  { %v743_v8 = vmax.f32 %v473_v3, 0.0  ;;  %v2370_v9 = vpop.f32.mrb[14].mxu0 }
 0x119   :  { %v818_v11 = vadd.f32 %v817_v6, %v816_v4  ;;  %v488_v12 = vadd.f32 %v2370_v9, %v3238_v0  ;;  %v482_v13 = vpop.f32.mrb[15].mxu0  ;;  %v821_v17 = vsel %vm795_vm5, %v744_v7, 0.0 }
 0x11a   :  { %v819_v14 = vsel %vm795_vm5, %v743_v8, 0.0  ;;  %v483_v15 = vadd.f32 %v3238_v0, %v482_v13 }
 0x11b   :  { %v820_v16 = vadd.f32 %v819_v14, %v818_v11  ;;  %v746_v18 = vmax.f32 %v488_v12, 0.0 }
 0x11c   :  { %v745_v19 = vmax.f32 %v483_v15, 0.0  ;;  %v2373_v20 = vpop.f32.mrb[16].mxu0 }
 0x11d   :  { %v822_v21 = vadd.f32 %v821_v17, %v820_v16  ;;  %v498_v22 = vadd.f32 %v2373_v20, %v3238_v0  ;;  %v492_v23 = vpop.f32.mrb[17].mxu0  ;;  %v825_v27 = vsel %vm795_vm5, %v746_v18, 0.0 }
 0x11e   :  { %v823_v24 = vsel %vm795_vm5, %v745_v19, 0.0  ;;  %v493_v25 = vadd.f32 %v3238_v0, %v492_v23 }
 0x11f   :  { %v824_v26 = vadd.f32 %v823_v24, %v822_v21  ;;  %v748_v28 = vmax.f32 %v498_v22, 0.0 }
 0x120   :  { %v747_v29 = vmax.f32 %v493_v25, 0.0  ;;  %v2376_v30 = vpop.f32.mrb[18].mxu0 }
 0x121   :  { %v826_v31 = vadd.f32 %v825_v27, %v824_v26  ;;  %v508_v32 = vadd.f32 %v2376_v30, %v3238_v0  ;;  %v502_v33 = vpop.f32.mrb[19].mxu0  ;;  %v829_v37 = vsel %vm795_vm5, %v748_v28, 0.0 }
 0x122   :  { %v827_v34 = vsel %vm795_vm5, %v747_v29, 0.0  ;;  %v503_v35 = vadd.f32 %v3238_v0, %v502_v33 }
 0x123   :  { %v828_v36 = vadd.f32 %v827_v34, %v826_v31  ;;  %v750_v39 = vmax.f32 %v508_v32, 0.0 }
 0x124   :  { %v749_v40 = vmax.f32 %v503_v35, 0.0  ;;  %v2379_v41 = vpop.f32.mrb[20].mxu0 }
 0x125   :  { %v830_v42 = vadd.f32 %v829_v37, %v828_v36  ;;  %v518_v43 = vadd.f32 %v2379_v41, %v3238_v0  ;;  %v512_v44 = vpop.f32.mrb[21].mxu0  ;;  %v833_v48 = vsel %vm795_vm5, %v750_v39, 0.0 }
 0x126   :  { %v831_v45 = vsel %vm795_vm5, %v749_v40, 0.0  ;;  %v513_v46 = vadd.f32 %v3238_v0, %v512_v44 }
 0x127   :  { %v832_v47 = vadd.f32 %v831_v45, %v830_v42  ;;  %v752_v49 = vmax.f32 %v518_v43, 0.0 }
 0x128   :  { %v751_v50 = vmax.f32 %v513_v46, 0.0  ;;  %v2382_v51 = vpop.f32.mrb[22].mxu0 }
 0x129   :  { %v834_v52 = vadd.f32 %v833_v48, %v832_v47  ;;  %v528_v53 = vadd.f32 %v2382_v51, %v3238_v0  ;;  %v522_v54 = vpop.f32.mrb[23].mxu0  ;;  %v837_v58 = vsel %vm795_vm5, %v752_v49, 0.0 }
 0x12a   :  { %v835_v55 = vsel %vm795_vm5, %v751_v50, 0.0  ;;  %v523_v56 = vadd.f32 %v3238_v0, %v522_v54 }
 0x12b   :  { %v836_v57 = vadd.f32 %v835_v55, %v834_v52  ;;  %v754_v59 = vmax.f32 %v528_v53, 0.0 }
 0x12c   :  { %v753_v60 = vmax.f32 %v523_v56, 0.0  ;;  %v2385_v61 = vpop.f32.mrb[24].mxu0 }
 0x12d   :  { %v838_v62 = vadd.f32 %v837_v58, %v836_v57  ;;  %v538_v63 = vadd.f32 %v2385_v61, %v3238_v0  ;;  %v532_v1 = vpop.f32.mrb[25].mxu0  ;;  %v841_v7 = vsel %vm795_vm5, %v754_v59, 0.0 }
 0x12e   :  { %v839_v3 = vsel %vm795_vm5, %v753_v60, 0.0  ;;  %v533_v4 = vadd.f32 %v3238_v0, %v532_v1 }
 0x12f   :  { %v840_v6 = vadd.f32 %v839_v3, %v838_v62  ;;  %v756_v8 = vmax.f32 %v538_v63, 0.0 }
 0x130   :  { %v755_v9 = vmax.f32 %v533_v4, 0.0  ;;  %v2388_v11 = vpop.f32.mrb[26].mxu0 }
 0x131   :  { %v842_v12 = vadd.f32 %v841_v7, %v840_v6  ;;  %v548_v13 = vadd.f32 %v2388_v11, %v3238_v0  ;;  %v542_v14 = vpop.f32.mrb[27].mxu0  ;;  %v845_v18 = vsel %vm795_vm5, %v756_v8, 0.0 }
 0x132   :  { %v843_v15 = vsel %vm795_vm5, %v755_v9, 0.0  ;;  %v543_v16 = vadd.f32 %v3238_v0, %v542_v14 }
 0x133   :  { %v844_v17 = vadd.f32 %v843_v15, %v842_v12  ;;  %v758_v19 = vmax.f32 %v548_v13, 0.0 }
 0x134   :  { %v757_v20 = vmax.f32 %v543_v16, 0.0  ;;  %v2391_v21 = vpop.f32.mrb[28].mxu0 }
 0x135   :  { %v846_v22 = vadd.f32 %v845_v18, %v844_v17  ;;  %v558_v23 = vadd.f32 %v2391_v21, %v3238_v0  ;;  %v552_v24 = vpop.f32.mrb[29].mxu0  ;;  %v849_v28 = vsel %vm795_vm5, %v758_v19, 0.0 }
 0x136   :  { %v847_v25 = vsel %vm795_vm5, %v757_v20, 0.0  ;;  %v553_v26 = vadd.f32 %v3238_v0, %v552_v24 }
 0x137   :  { %v848_v27 = vadd.f32 %v847_v25, %v846_v22  ;;  %v760_v29 = vmax.f32 %v558_v23, 0.0 }
 0x138   :  { %v759_v30 = vmax.f32 %v553_v26, 0.0  ;;  %v2394_v31 = vpop.f32.mrb[30].mxu0 }
 0x139   :  { %v850_v32 = vadd.f32 %v849_v28, %v848_v27  ;;  %v568_v33 = vadd.f32 %v2394_v31, %v3238_v0  ;;  %v562_v34 = vpop.f32.mrb[31].mxu0  ;;  %v853_v39 = vsel %vm795_vm5, %v760_v29, 0.0 }
 0x13a   :  { %v851_v35 = vsel %vm795_vm5, %v759_v30, 0.0  ;;  %v563_v36 = vadd.f32 %v3238_v0, %v562_v34 }
 0x13b   :  { %v852_v37 = vadd.f32 %v851_v35, %v850_v32  ;;  %v762_v40 = vmax.f32 %v568_v33, 0.0 }
 0x13c   :  { %v761_v41 = vmax.f32 %v563_v36, 0.0  ;;  %v2397_v42 = vpop.f32.mrb[32].mxu0 }
 0x13d   :  { %v854_v43 = vadd.f32 %v853_v39, %v852_v37  ;;  %v578_v44 = vadd.f32 %v2397_v42, %v3238_v0  ;;  %v572_v45 = vpop.f32.mrb[33].mxu0  ;;  %v857_v50 = vsel %vm795_vm5, %v762_v40, 0.0 }
 0x13e   :  { %v855_v46 = vsel %vm795_vm5, %v761_v41, 0.0  ;;  %v573_v47 = vadd.f32 %v3238_v0, %v572_v45 }
 0x13f   :  { %v856_v48 = vadd.f32 %v855_v46, %v854_v43  ;;  %v764_v49 = vmax.f32 %v578_v44, 0.0 }
 0x140   :  { %v763_v51 = vmax.f32 %v573_v47, 0.0  ;;  %v2400_v52 = vpop.f32.mrb[34].mxu0 }
 0x141   :  { %v3310_v53 = vadd.f32 %v857_v50, %v856_v48  ;;  %v868_v54 = vsel %vm795_vm5, %v764_v49, 0.0  ;;  %v588_v55 = vadd.f32 %v2400_v52, %v3238_v0  ;;  %v582_v56 = vpop.f32.mrb[35].mxu0 }
 0x142   :  { %v867_v57 = vsel %vm795_vm5, %v763_v51, 0.0  ;;  %v583_v58 = vadd.f32 %v3238_v0, %v582_v56 }
 0x143   :  { %v869_v59 = vadd.f32 %v868_v54, %v867_v57  ;;  %v766_v60 = vmax.f32 %v588_v55, 0.0 }
 0x144   :  { %v765_v61 = vmax.f32 %v583_v58, 0.0  ;;  %v2403_v62 = vpop.f32.mrb[36].mxu0 }
 0x145   :  { %v598_v63 = vadd.f32 %v2403_v62, %v3238_v0  ;;  %v592_v1 = vpop.f32.mrb[37].mxu0  ;;  %v872_v7 = vsel %vm795_vm5, %v766_v60, 0.0 }
 0x146   :  { %v870_v3 = vsel %vm795_vm5, %v765_v61, 0.0  ;;  %v593_v4 = vadd.f32 %v3238_v0, %v592_v1 }
 0x147   :  { %v871_v6 = vadd.f32 %v870_v3, %v869_v59  ;;  %v768_v8 = vmax.f32 %v598_v63, 0.0 }
 0x148   :  { %v767_v9 = vmax.f32 %v593_v4, 0.0  ;;  %v2406_v11 = vpop.f32.mrb[38].mxu0 }
 0x149   :  { %v873_v12 = vadd.f32 %v872_v7, %v871_v6  ;;  %v608_v13 = vadd.f32 %v2406_v11, %v3238_v0  ;;  %v602_v14 = vpop.f32.mrb[39].mxu0  ;;  %v876_v18 = vsel %vm795_vm5, %v768_v8, 0.0 }
 0x14a   :  { %v874_v15 = vsel %vm795_vm5, %v767_v9, 0.0  ;;  %v603_v16 = vadd.f32 %v3238_v0, %v602_v14 }
 0x14b   :  { %v875_v17 = vadd.f32 %v874_v15, %v873_v12  ;;  %v770_v19 = vmax.f32 %v608_v13, 0.0 }
 0x14c   :  { %v769_v20 = vmax.f32 %v603_v16, 0.0  ;;  %v2409_v21 = vpop.f32.mrb[40].mxu0 }
 0x14d   :  { %v877_v22 = vadd.f32 %v876_v18, %v875_v17  ;;  %v618_v23 = vadd.f32 %v2409_v21, %v3238_v0  ;;  %v612_v24 = vpop.f32.mrb[41].mxu0  ;;  %v880_v28 = vsel %vm795_vm5, %v770_v19, 0.0 }
 0x14e   :  { %v878_v25 = vsel %vm795_vm5, %v769_v20, 0.0  ;;  %v613_v26 = vadd.f32 %v3238_v0, %v612_v24 }
 0x14f   :  { %v879_v27 = vadd.f32 %v878_v25, %v877_v22  ;;  %v772_v29 = vmax.f32 %v618_v23, 0.0 }
 0x150   :  { %v771_v30 = vmax.f32 %v613_v26, 0.0  ;;  %v2412_v31 = vpop.f32.mrb[42].mxu0 }
 0x151   :  { %v881_v32 = vadd.f32 %v880_v28, %v879_v27  ;;  %v628_v33 = vadd.f32 %v2412_v31, %v3238_v0  ;;  %v622_v34 = vpop.f32.mrb[43].mxu0  ;;  %v884_v39 = vsel %vm795_vm5, %v772_v29, 0.0 }
 0x152   :  { %v882_v35 = vsel %vm795_vm5, %v771_v30, 0.0  ;;  %v623_v36 = vadd.f32 %v3238_v0, %v622_v34 }
 0x153   :  { %v883_v37 = vadd.f32 %v882_v35, %v881_v32  ;;  %v774_v40 = vmax.f32 %v628_v33, 0.0 }
 0x154   :  { %v773_v41 = vmax.f32 %v623_v36, 0.0  ;;  %v2415_v42 = vpop.f32.mrb[44].mxu0 }
 0x155   :  { %v885_v43 = vadd.f32 %v884_v39, %v883_v37  ;;  %v638_v44 = vadd.f32 %v2415_v42, %v3238_v0  ;;  %v632_v45 = vpop.f32.mrb[45].mxu0  ;;  %v888_v49 = vsel %vm795_vm5, %v774_v40, 0.0 }
 0x156   :  { %v886_v46 = vsel %vm795_vm5, %v773_v41, 0.0  ;;  %v633_v47 = vadd.f32 %v3238_v0, %v632_v45 }
 0x157   :  { %v887_v48 = vadd.f32 %v886_v46, %v885_v43  ;;  %v776_v50 = vmax.f32 %v638_v44, 0.0 }
 0x158   :  { %v775_v51 = vmax.f32 %v633_v47, 0.0  ;;  %v2418_v52 = vpop.f32.mrb[46].mxu0 }
 0x159   :  { %v889_v54 = vadd.f32 %v888_v49, %v887_v48  ;;  %v648_v55 = vadd.f32 %v2418_v52, %v3238_v0  ;;  %v642_v56 = vpop.f32.mrb[47].mxu0  ;;  %v892_v60 = vsel %vm795_vm5, %v776_v50, 0.0 }
 0x15a   :  { %v890_v57 = vsel %vm795_vm5, %v775_v51, 0.0  ;;  %v643_v58 = vadd.f32 %v3238_v0, %v642_v56 }
 0x15b   :  { %v891_v59 = vadd.f32 %v890_v57, %v889_v54  ;;  %v778_v61 = vmax.f32 %v648_v55, 0.0 }
 0x15c   :  { %v777_v62 = vmax.f32 %v643_v58, 0.0  ;;  %v2421_v63 = vpop.f32.mrb[48].mxu0 }
 0x15d   :  { %v893_v1 = vadd.f32 %v892_v60, %v891_v59  ;;  %v658_v3 = vadd.f32 %v2421_v63, %v3238_v0  ;;  %v652_v4 = vpop.f32.mrb[49].mxu0  ;;  %v896_v9 = vsel %vm795_vm5, %v778_v61, 0.0 }
 0x15e   :  { %v894_v6 = vsel %vm795_vm5, %v777_v62, 0.0  ;;  %v653_v7 = vadd.f32 %v3238_v0, %v652_v4 }
 0x15f   :  { %v895_v8 = vadd.f32 %v894_v6, %v893_v1  ;;  %v780_v11 = vmax.f32 %v658_v3, 0.0 }
 0x160   :  { %v779_v12 = vmax.f32 %v653_v7, 0.0  ;;  %v2424_v13 = vpop.f32.mrb[50].mxu0 }
 0x161   :  { %v897_v14 = vadd.f32 %v896_v9, %v895_v8  ;;  %v668_v15 = vadd.f32 %v2424_v13, %v3238_v0  ;;  %v662_v16 = vpop.f32.mrb[51].mxu0  ;;  %v900_v20 = vsel %vm795_vm5, %v780_v11, 0.0  ;;  %v859_v11 = vrot.slane %v3310_v53, 4 }
 0x162   :  { %v898_v17 = vsel %vm795_vm5, %v779_v12, 0.0  ;;  %v663_v18 = vadd.f32 %v3238_v0, %v662_v16 }
 0x163   :  { %v899_v19 = vadd.f32 %v898_v17, %v897_v14  ;;  %v782_v21 = vmax.f32 %v668_v15, 0.0 }
 0x164   :  { %v781_v22 = vmax.f32 %v663_v18, 0.0  ;;  %v2427_v23 = vpop.f32.mrb[52].mxu0 }
 0x165   :  { %v901_v24 = vadd.f32 %v900_v20, %v899_v19  ;;  %v678_v25 = vadd.f32 %v2427_v23, %v3238_v0  ;;  %v672_v26 = vpop.f32.mrb[53].mxu0  ;;  %v904_v30 = vsel %vm795_vm5, %v782_v21, 0.0 }
 0x166   :  { %v902_v27 = vsel %vm795_vm5, %v781_v22, 0.0  ;;  %v673_v28 = vadd.f32 %v3238_v0, %v672_v26  ;;  %v860_v22 = vadd.f32 %v859_v11, %v3310_v53 }
 0x167   :  { %v903_v29 = vadd.f32 %v902_v27, %v901_v24  ;;  %v784_v31 = vmax.f32 %v678_v25, 0.0 }
 0x168   :  { %v783_v32 = vmax.f32 %v673_v28, 0.0  ;;  %v2430_v33 = vpop.f32.mrb[54].mxu0 }
 0x169   :  { %v905_v34 = vadd.f32 %v904_v30, %v903_v29  ;;  %v688_v35 = vadd.f32 %v2430_v33, %v3238_v0  ;;  %v682_v36 = vpop.f32.mrb[55].mxu0  ;;  %v908_v41 = vsel %vm795_vm5, %v784_v31, 0.0  ;;  %v861_v29 = vrot.slane %v860_v22, 2 }
 0x16a   :  { %v906_v37 = vsel %vm795_vm5, %v783_v32, 0.0  ;;  %v683_v39 = vadd.f32 %v3238_v0, %v682_v36 }
 0x16b   :  { %v907_v40 = vadd.f32 %v906_v37, %v905_v34  ;;  %v786_v42 = vmax.f32 %v688_v35, 0.0  ;;  %v862_v33 = vadd.f32 %v861_v29, %v860_v22  ;;  %v2755_v22 = vmov 1.0  }
 0x16c   :  { %v785_v43 = vmax.f32 %v683_v39, 0.0  ;;  %v2433_v44 = vpop.f32.mrb[56].mxu0 }
 0x16d   :  { %v909_v45 = vadd.f32 %v908_v41, %v907_v40  ;;  %v698_v46 = vadd.f32 %v2433_v44, %v3238_v0  ;;  %v692_v47 = vpop.f32.mrb[57].mxu0  ;;  %v912_v51 = vsel %vm795_vm5, %v786_v42, 0.0  ;;  %v1198_v42 = vld [vmem:[%s3642_s7] sm:$0xff] }
 0x16e   :  { %v910_v48 = vsel %vm795_vm5, %v785_v43, 0.0  ;;  %v693_v49 = vadd.f32 %v3238_v0, %v692_v47  ;;  %v1199_v43 = vld [vmem:[%s3642_s7 + $0x8] sm:$0xff] }
 0x16f   :  { %v911_v50 = vadd.f32 %v910_v48, %v909_v45  ;;  %v788_v52 = vmax.f32 %v698_v46, 0.0  ;;  %v2601_v47 = vpack.c.bf16 %v1199_v43, %v1198_v42  ;;  %v1200_v48 = vld [vmem:[%s3642_s7 + $0x10] sm:$0xff] }
 0x170   :  { %v787_v54 = vmax.f32 %v693_v49, 0.0  ;;  %v2436_v55 = vpop.f32.mrb[58].mxu0  ;;  %v1201_v49 = vld [vmem:[%s3642_s7 + $0x18] sm:$0xff] }
 0x171   :  { %v913_v56 = vadd.f32 %v912_v51, %v911_v50  ;;  %v708_v57 = vadd.f32 %v2436_v55, %v3238_v0  ;;  %v702_v58 = vpop.f32.mrb[59].mxu0  ;;  %v916_v62 = vsel %vm795_vm5, %v788_v52, 0.0  ;;  %v2604_v51 = vpack.c.bf16 %v1201_v49, %v1200_v48  ;;  %v1288_v55 = vld [vmem:[%s3644_s9 + $0x8] sm:$0xff] }
 0x172   :  { %v914_v59 = vsel %vm795_vm5, %v787_v54, 0.0  ;;  %v703_v60 = vadd.f32 %v3238_v0, %v702_v58  ;;  %v1287_v54 = vld [vmem:[%s3644_s9] sm:$0xff]  ;;  %v1290_v58 = vld [vmem:[%s3644_s9 + $0x18] sm:$0xff] }
 0x173   :  { %v915_v61 = vadd.f32 %v914_v59, %v913_v56  ;;  %v790_v63 = vmax.f32 %v708_v57, 0.0  ;;  %v1289_v56 = vld [vmem:[%s3644_s9 + $0x10] sm:$0xff]  ;;  %v2607_v57 = vpack.c.bf16 %v1288_v55, %v1287_v54 }
 0x174   :  { %v789_v1 = vmax.f32 %v703_v60, 0.0  ;;  %v2439_v3 = vpop.f32.mrb[60].mxu0  ;;  %v2610_v59 = vpack.c.bf16 %v1290_v58, %v1289_v56  ;;  %v1291_v60 = vld [vmem:[%s3644_s9 + $0x20] sm:$0xff] }
 0x175   :  { %v917_v4 = vadd.f32 %v916_v62, %v915_v61  ;;  %v718_v6 = vadd.f32 %v2439_v3, %v3238_v0  ;;  %v712_v7 = vpop.f32.mrb[61].mxu0  ;;  %v920_v13 = vsel %vm795_vm5, %v790_v63, 0.0  ;;  %v1292_v61 = vld [vmem:[%s3644_s9 + $0x28] sm:$0xff]  ;;  %v1293_v63 = vld [vmem:[%s3644_s9 + $0x30] sm:$0xff] }
 0x176   :  { %v918_v8 = vsel %vm795_vm5, %v789_v1, 0.0  ;;  %v713_v9 = vadd.f32 %v3238_v0, %v712_v7  ;;  %v2613_v62 = vpack.c.bf16 %v1292_v61, %v1291_v60  ;;  %v1294_v1 = vld [vmem:[%s3644_s9 + $0x38] sm:$0xff] }
 0x177   :  { %v919_v12 = vadd.f32 %v918_v8, %v917_v4  ;;  %v792_v14 = vmax.f32 %v718_v6, 0.0  ;;  %v2616_v3 = vpack.c.bf16 %v1294_v1, %v1293_v63  ;;  %v2177_v4 = vld [vmem:[%s3641_s6] ss:$0 sm:$0xff] }
 0x178   :  { %v791_v15 = vmax.f32 %v713_v9, 0.0  ;;  %v2442_v16 = vpop.f32.mrb[62].mxu0 }
 0x179   :  { %v921_v17 = vadd.f32 %v920_v13, %v919_v12  ;;  %v728_v18 = vadd.f32 %v2442_v16, %v3238_v0  ;;  %v722_v19 = vpop.f32.mrb[63].mxu0  ;;  %v924_v24 = vsel %vm795_vm5, %v792_v14, 0.0  ;;  %v1376_v12 = vld [vmem:[%s3646_s11] sm:$0xff]  ;;  %v1377_v13 = vld [vmem:[%s3646_s11 + $0x8] sm:$0xff]  ;;  %s2757_s11 = smov [#allocation6]  }
 0x17a   :  { %v922_v20 = vsel %vm795_vm5, %v791_v15, 0.0  ;;  %v723_v21 = vadd.f32 %v3238_v0, %v722_v19  ;;  %v863_v0 = vrot.slane %v862_v33, 1  ;;  %v2179_v14 = vld [vmem:[%s3643_s8] ss:$0 sm:$0xff]  ;;  %v1383_v15 = vmul.f32 %v1376_v12, %v1376_v12 }
 0x17b   :  { %v923_v23 = vadd.f32 %v922_v20, %v921_v17  ;;  %v794_v25 = vmax.f32 %v728_v18, 0.0  ;;  %v1384_v16 = vmul.f32 %v1377_v13, %v1377_v13 }
 0x17c   :  { %v793_v26 = vmax.f32 %v723_v21, 0.0  ;;  %v864_v41 = vadd.f32 %v863_v0, %v862_v33  ;;  %v2623_v21 = vpack.c.bf16 %v1377_v13, %v1376_v12 }
 0x17d   :  { %v925_v27 = vadd.f32 %v924_v24, %v923_v23  ;;  %v928_v31 = vsel %vm795_vm5, %v794_v25, 0.0  ;;  %v2619_v18 = vpack.c.bf16 %v1384_v16, %v1383_v15  ;;  %v2181_v23 = vld [vmem:[%s3645_s10] ss:$0 sm:$0xff]  ;;  %v1696_v16 = vld [vmem:[%s3647_s12 + $0x8] sm:$0xff] }
 0x17e   :  { %v926_v28 = vsel %vm795_vm5, %v793_v26, 0.0  ;;  %v866_v45 = vmul.f32 0.00390625, %v864_v41  ;;  %v1695_v15 = vld [vmem:[%s3647_s12] sm:$0xff] }
 0x17f   :  { %v927_v30 = vadd.f32 %v926_v28, %v925_v27  ;;  %v1112_v36 = vpop.f32.mrb[0].mxu1 }
 0x180   :  { %v2453_v53 = vpop.f32.mrb[1].mxu1  ;;  %v1116_v52 = vmul.f32 0.125, %v1112_v36 }
 0x181   :  { %v929_v32 = vadd.f32 %v928_v31, %v927_v30  ;;  %v1544_v31 = vshrl.u32 %v939_v2, 7 }
 0x183   :  { %v930_v34 = vrot.slane %v929_v32, 4 }
 0x185   :  { %v931_v35 = vadd.f32 %v930_v34, %v929_v32  ;;  %v1545_v32 = vsub.s32 0, %v1544_v31  ;;  %v1705_v31 = vld [vmem:[%s3647_s12 + $0x50] sm:$0xff] }
 0x187   :  { %v932_v37 = vrot.slane %v931_v35, 2 }
 0x189   :  { %v933_v39 = vadd.f32 %v932_v37, %v931_v35 }
 0x18b   :  { %v934_v40 = vrot.slane %v933_v39, 1 }
 0x18d   :  { %v935_v44 = vadd.f32 %v934_v40, %v933_v39 }
 0x18f   :  { %v936_v46 = vmul.f32 0.00390625, %v935_v44 }
 0x191   :  { %v938_v50 = vsel %vm937_vm3, %v866_v45, %v936_v46  ;;  %v1560_v45 = vcvt.s32.f32 %v3136_v5 }
 0x192   :  { %2457 = vmatmul.mubr.msk.f32.vlgmr.msra.gmra.mrb[2].mxu1 %vm795_vm5, %v938_v50 }
 0x193   :  { %2602 = vmatpush3.bf16.msra.mxu1 %v2601_v47  ;;  %2467 = vmatprep.mubr.msk.f32.mxu1 %vm2753_vm2, %v2751_v10 }
 0x194   :  { %2603 = vmatprep.subr.bf16.mxu1 %v2752_v38 }
 0x197   :  { %2605 = vmatpush3.bf16.msra.mxu1 %v2604_v51 }
 0x198   :  { %2606 = vmatprep.subr.bf16.mxu1 %v2752_v38 }
 0x19a   :  { %2468 = vmatmul.mubr.msk.f32.vlgmr.msra.gmra.mrb[4].mxu1 %vm1042_vm4, %v1116_v52 }
 0x19b   :  { %2486 = vmatprep.mubr.msk.f32.mxu1 %vm2753_vm2, %v2751_v10  ;;  %2608 = vmatpush3.bf16.msra.mxu1 %v2607_v57 }
 0x19c   :  { %2609 = vmatprep.subr.bf16.mxu1 %v2752_v38 }
 0x19f   :  { %2611 = vmatpush3.bf16.msra.mxu1 %v2610_v59 }
 0x1a0   :  { %2612 = vmatprep.subr.bf16.mxu1 %v2752_v38 }
 0x1a3   :  { %2614 = vmatpush3.bf16.msra.mxu1 %v2613_v62 }
 0x1a4   :  { %2615 = vmatprep.subr.bf16.mxu1 %v2752_v38 }
 0x1a7   :  { %2617 = vmatpush3.bf16.msra.mxu1 %v2616_v3 }
 0x1a8   :  { %2618 = vmatprep.subr.bf16.mxu1 %v2752_v38 }
 0x265   :  { %v1194_v6 = vpop.f32.mrb[2].mxu1 }
 0x266   :  { %v1195_v7 = vadd.f32 %v2177_v4, %v1194_v6  ;;  %v2458_v8 = vpop.f32.mrb[3].mxu1 }
 0x268   :  { %1283 = vrot.lane.b32.xlu0 %v1195_v7, %s2754_s1 }
 0x26d   :  { %v1278_v9 = vpop.f32.mrb[4].mxu1 }
 0x26e   :  { %v2469_v11 = vpop.f32.mrb[5].mxu1  ;;  %v1279_v17 = vadd.f32 %v2179_v14, %v1278_v9 }
 0x2da   :  { %v1284_v19 = vpop.permute.xlu0 %1283 }
 0x2db   :  { %v3440_v20 = vsel %vm1042_vm4, %v1279_v17, %v1284_v19  ;;  %v1697_v17 = vld [vmem:[%s3647_s12 + $0x10] sm:$0xff]  ;;  %v1698_v19 = vld [vmem:[%s3647_s12 + $0x18] sm:$0xff] }
 0x2dc   :  { %2487 = vmatmul.mubr.msk.f32.vlgmr.msra.gmra.mrb[6].mxu1 %vm1302_vm6, %v3440_v20 }
 0x2dd   :  { %2621 = vmatpush3.bf16.xpose.msk.msra.mxu1 %vm2620_vm7, %v2619_v18  ;;  %2493 = vmatprep.mubr.msk.f32.mxu1 %vm2753_vm2, %v2751_v10  ;;  %v2630_v18 = vpack.c.bf16 %v1696_v16, %v1695_v15  ;;  %v2198_v15 = vld [vmem:[%s3652_s17] ss:$0 sm:$0xff] }
 0x2de   :  { %2622 = vmatprep.subr.bf16.mxu1 %v2752_v38 }
 0x2e4   :  { %2494 = vmatmul.mubr.msk.f32.vlgmr.msra.gmra.mrb[8].mxu1 %vm1042_vm4, %v2755_v22  ;;  %v1699_v22 = vld [vmem:[%s3647_s12 + $0x20] sm:$0xff] }
 0x2e5   :  { %2625 = vmatpush3.bf16.xpose.msk.msra.mxu1 %vm2620_vm7, %v2623_v21  ;;  %2500 = vmatprep.mubr.msk.f32.mxu1 %vm2753_vm2, %v2751_v10 }
 0x2e6   :  { %2626 = vmatprep.subr.bf16.mxu1 %v2752_v38 }
 0x3af   :  { %v1372_v24 = vpop.f32.mrb[6].mxu1 }
 0x3b0   :  { %v1373_v25 = vadd.f32 %v2181_v23, %v1372_v24  ;;  %v2488_v26 = vpop.f32.mrb[7].mxu1  ;;  %v1700_v23 = vld [vmem:[%s3647_s12 + $0x28] sm:$0xff] }
 0x3b1   :  { %v2636_v24 = vpack.c.bf16 %v1700_v23, %v1699_v22  ;;  %v1702_v26 = vld [vmem:[%s3647_s12 + $0x38] sm:$0xff] }
 0x3b2   :  { %2501 = vmatmul.mubr.msk.f32.vlgmr.msra.gmra.mrb[10].mxu1 %vm1042_vm4, %v1373_v25  ;;  %v1378_v27 = vmul.f32 %v1373_v25, %v1373_v25  ;;  %v1701_v25 = vld [vmem:[%s3647_s12 + $0x30] sm:$0xff] }
 0x3b3   :  { %2628 = vmatpush3.bf16.msra.mxu1 %v2623_v21  ;;  %2507 = vmatprep.mubr.msk.f32.mxu1 %vm2753_vm2, %v2751_v10  ;;  %v2633_v21 = vpack.c.bf16 %v1698_v19, %v1697_v17 }
 0x3b4   :  { %v1380_v28 = vsel %vm1379_vm8, %v1378_v27, 0.0  ;;  %2629 = vmatprep.subr.bf16.mxu1 %v2752_v38  ;;  %v2639_v27 = vpack.c.bf16 %v1702_v26, %v1701_v25 }
 0x3b5   :  { %1381 = vadd.xlane.f32.xlu0 %v1380_v28  ;;  %v1703_v28 = vld [vmem:[%s3647_s12 + $0x40] sm:$0xff] }
 0x3b7   :  { %v1460_v29 = vpop.f32.mrb[8].mxu1 }
 0x3b8   :  { %v2495_v30 = vpop.f32.mrb[9].mxu1  ;;  %v1546_v33 = vrot.slane %v1460_v29, %v1545_v32  ;;  %v1704_v29 = vld [vmem:[%s3647_s12 + $0x48] sm:$0xff]  ;;  %v1706_v32 = vld [vmem:[%s3647_s12 + $0x58] sm:$0xff] }
 0x3b9   :  { %v2642_v30 = vpack.c.bf16 %v1704_v29, %v1703_v28 }
 0x442   :  { %v1382_v34 = vpop.xlane.xlu0 %1381 }
 0x443   :  { %v1547_v36 = vadd.f32 %v1546_v33, %v1382_v34  ;;  %v2645_v33 = vpack.c.bf16 %v1706_v32, %v1705_v31 }
 0x485   :  { %v1539_v35 = vpop.f32.mrb[10].mxu1 }
 0x486   :  { %v1548_v0 = vmul.f32 2.0, %v1539_v35  ;;  %v2502_v37 = vpop.f32.mrb[11].mxu1 }
 0x487   :  { %v1790_v37 = vld [vmem:[%s3649_s14 + $0x8] sm:$0xff] }
 0x488   :  { %v1549_v53 = vsub.f32 %v1547_v36, %v1548_v0  ;;  %v1789_v0 = vld [vmem:[%s3649_s14] sm:$0xff] }
 0x48a   :  { %v1550_v39 = vmax.f32 %v1549_v53, 0.0  ;;  %v1561_v40 = vsel %vm1558_vm9, %v1549_v53, inf }
 0x48b   :  { %1562 = vmin.xlane.f32.xlu1 %v1561_v40  ;;  %v1791_v40 = vld [vmem:[%s3649_s14 + $0x10] sm:$0xff] }
 0x48c   :  { %2686 = vrsqrt.f32 %v1550_v39  ;;  %vm1553_vm10 = vcmp.eq.f32.partialorder %v1550_v39, inf  ;;  %v1556_v43 = vand.u32 2147483648, %v1550_v39  ;;  %vm1555_vm11 = vcmp.eq.f32.partialorder %v1550_v39, 0.0 }
 0x496   :  { %v2687_v41 = vpop.eup %2686 }
 0x497   :  { %v1552_v42 = vmul.f32 %v2687_v41, %v1550_v39  ;;  %v1792_v41 = vld [vmem:[%s3649_s14 + $0x18] sm:$0xff] }
 0x499   :  { %v1554_v44 = vsel %vm1553_vm10, %v1550_v39, %v1552_v42 }
 0x49a   :  { %v1557_v2 = vsel %vm1555_vm11, %v1556_v43, %v1554_v44  ;;  %v2651_v43 = vpack.c.bf16 %v1792_v41, %v1791_v40  ;;  %v1793_v44 = vld [vmem:[%s3649_s14 + $0x20] sm:$0xff] }
 0x49b   :  { %1559 = vst.msk [vmem:[#allocation6] sm:$0x3] %vm1558_vm9, %v1557_v2  ;;  %v1794_v2 = vld [vmem:[%s3649_s14 + $0x28] sm:$0xff] }
 0x518   :  { %v1563_v46 = vpop.xlane.xlu1 %1562 }
 0x519   :  { %vm1564_vm12 = vcmp.eq.f32.partialorder %v1549_v53, %v1563_v46  ;;  %v1796_v46 = vld [vmem:[%s3649_s14 + $0x38] sm:$0xff] }
 0x51a   :  { %v1565_v47 = vsel %vm1564_vm12, %v1560_v45, 16.0  ;;  %vm1615_vm12 = vcmask 130048  }
 0x51b   :  { %v1566_v48 = vsel %vm1558_vm9, %v1565_v47, inf }
 0x51c   :  { %1567 = vmin.xlane.f32.xlu1 %v1566_v48  ;;  %v2194_v48 = vld [vmem:[%s3648_s13] ss:$0 sm:$0xff] }
 0x5a9   :  { %v1568_v49 = vpop.xlane.xlu1 %1567 }
 0x5aa   :  { %vm1569_vm13 = vcmp.eq.f32.partialorder %v1560_v45, %v1568_v49  ;;  %v1877_v49 = vld [vmem:[%s3651_s16] sm:$0xff] }
 0x5ab   :  { %v2189_v50 = vsel %vm1569_vm13, 1.0, %v2751_v10 }
 0x5ac   :  { %vm1573_vm14 = vcmp.gt.f32.partialorder %v2189_v50, 0.5 }
 0x5ad   :  { %v1574_v51 = vsel %vm1573_vm14, 1e+30, %v1549_v53  ;;  %v2648_v53 = vpack.c.bf16 %v1790_v37, %v1789_v0 }
 0x5ae   :  { %v1575_v52 = vsel %vm1558_vm9, %v1574_v51, inf }
 0x5af   :  { %1576 = vmin.xlane.f32.xlu1 %v1575_v52 }
 0x63c   :  { %v1577_v54 = vpop.xlane.xlu1 %1576 }
 0x63d   :  { %vm1578_vm15 = vcmp.eq.f32.partialorder %v1574_v51, %v1577_v54 }
 0x63e   :  { %v1579_v55 = vsel %vm1578_vm15, %v1560_v45, 16.0 }
 0x63f   :  { %v1580_v5 = vsel %vm1558_vm9, %v1579_v55, inf }
 0x640   :  { %1581 = vmin.xlane.f32.xlu1 %v1580_v5 }
 0x6cd   :  { %v1582_v56 = vpop.xlane.xlu1 %1581 }
 0x6ce   :  { %vm1583_vm0 = vcmp.eq.f32.partialorder %v1560_v45, %v1582_v56  ;;  %v1879_v56 = vld [vmem:[%s3651_s16 + $0x10] sm:$0xff] }
 0x6cf   :  { %v2190_v57 = vsel %vm1583_vm0, 1.0, %v2751_v10 }
 0x6d0   :  { %vm1587_vm1 = vcmp.gt.f32.partialorder %v2190_v57, 0.5  ;;  %v1586_v1 = vadd.f32 %v2190_v57, %v2189_v50  ;;  %v1878_v50 = vld [vmem:[%s3651_s16 + $0x8] sm:$0xff]  ;;  %v1880_v57 = vld [vmem:[%s3651_s16 + $0x18] sm:$0xff] }
 0x6d1   :  { %v1588_v58 = vsel %vm1587_vm1, 1e+30, %v1574_v51  ;;  %v2660_v55 = vpack.c.bf16 %v1878_v50, %v1877_v49 }
 0x6d2   :  { %v1589_v59 = vsel %vm1558_vm9, %v1588_v58, inf }
 0x6d3   :  { %1590 = vmin.xlane.f32.xlu1 %v1589_v59  ;;  %v1881_v59 = vld [vmem:[%s3651_s16 + $0x20] sm:$0xff] }
 0x760   :  { %v1591_v60 = vpop.xlane.xlu1 %1590 }
 0x761   :  { %vm1592_vm3 = vcmp.eq.f32.partialorder %v1588_v58, %v1591_v60  ;;  %v1882_v60 = vld [vmem:[%s3651_s16 + $0x28] sm:$0xff] }
 0x762   :  { %v1593_v61 = vsel %vm1592_vm3, %v1560_v45, 16.0 }
 0x763   :  { %v1594_v62 = vsel %vm1558_vm9, %v1593_v61, inf  ;;  %v2666_v61 = vpack.c.bf16 %v1882_v60, %v1881_v59 }
 0x764   :  { %1595 = vmin.xlane.f32.xlu1 %v1594_v62  ;;  %v1883_v62 = vld [vmem:[%s3651_s16 + $0x30] sm:$0xff] }
 0x7f1   :  { %v1596_v63 = vpop.xlane.xlu1 %1595 }
 0x7f2   :  { %vm1597_vm5 = vcmp.eq.f32.partialorder %v1560_v45, %v1596_v63  ;;  %v1884_v63 = vld [vmem:[%s3651_s16 + $0x38] sm:$0xff] }
 0x7f3   :  { %v2191_v3 = vsel %vm1597_vm5, 1.0, %v2751_v10 }
 0x7f4   :  { %v1600_v4 = vadd.f32 %v2191_v3, %v1586_v1  ;;  %vm1601_vm7 = vcmp.gt.f32.partialorder %v2191_v3, 0.5  ;;  %v2669_v1 = vpack.c.bf16 %v1884_v63, %v1883_v62  ;;  %v1966_v3 = vld [vmem:[%s3653_s18] sm:$0xff] }
 0x7f5   :  { %v1602_v6 = vsel %vm1601_vm7, 1e+30, %v1588_v58  ;;  %v2663_v58 = vpack.c.bf16 %v1880_v57, %v1879_v56 }
 0x7f6   :  { %v1603_v7 = vsel %vm1558_vm9, %v1602_v6, inf }
 0x7f7   :  { %1604 = vmin.xlane.f32.xlu1 %v1603_v7 }
 0x884   :  { %v1605_v8 = vpop.xlane.xlu1 %1604 }
 0x885   :  { %vm1606_vm10 = vcmp.eq.f32.partialorder %v1602_v6, %v1605_v8  ;;  %v2196_v6 = vld [vmem:[%s3673_s27] ss:$0 sm:$0xff] }
 0x886   :  { %v1607_v9 = vsel %vm1606_vm10, %v1560_v45, 16.0 }
 0x887   :  { %v1608_v11 = vsel %vm1558_vm9, %v1607_v9, inf  ;;  %vm1714_vm9 = vcmask 785408  }
 0x888   :  { %1609 = vmin.xlane.f32.xlu1 %v1608_v11 }
 0x915   :  { %v1610_v12 = vpop.xlane.xlu1 %1609 }
 0x916   :  { %vm1611_vm11 = vcmp.eq.f32.partialorder %v1560_v45, %v1610_v12  ;;  %v2654_v45 = vpack.c.bf16 %v1794_v2, %v1793_v44  ;;  %v1968_v12 = vld [vmem:[%s3653_s18 + $0x10] sm:$0xff] }
 0x917   :  { %v2192_v13 = vsel %vm1611_vm11, 1.0, %v2751_v10 }
 0x918   :  { %v1614_v14 = vadd.f32 %v2192_v13, %v1600_v4  ;;  %v1967_v4 = vld [vmem:[%s3653_s18 + $0x8] sm:$0xff]  ;;  %v1969_v13 = vld [vmem:[%s3653_s18 + $0x18] sm:$0xff] }
 0x919   :  { %v2672_v8 = vpack.c.bf16 %v1967_v4, %v1966_v3 }
 0x91a   :  { %2508 = vmatmul.mubr.msk.f32.vlgmr.msra.gmra.mrb[12].mxu1 %vm1615_vm12, %v1614_v14  ;;  %v2675_v14 = vpack.c.bf16 %v1969_v13, %v1968_v12 }
 0x91b   :  { %2534 = vmatprep.mubr.msk.f32.mxu1 %vm2753_vm2, %v2751_v10  ;;  %2631 = vmatpush3.bf16.msra.mxu1 %v2630_v18 }
 0x91c   :  { %2632 = vmatprep.subr.bf16.mxu1 %v2752_v38 }
 0x91f   :  { %2634 = vmatpush3.bf16.msra.mxu1 %v2633_v21 }
 0x920   :  { %2635 = vmatprep.subr.bf16.mxu1 %v2752_v38 }
 0x923   :  { %2637 = vmatpush3.bf16.msra.mxu1 %v2636_v24 }
 0x924   :  { %2638 = vmatprep.subr.bf16.mxu1 %v2752_v38 }
 0x927   :  { %2640 = vmatpush3.bf16.msra.mxu1 %v2639_v27 }
 0x928   :  { %2641 = vmatprep.subr.bf16.mxu1 %v2752_v38 }
 0x92b   :  { %2643 = vmatpush3.bf16.msra.mxu1 %v2642_v30 }
 0x92c   :  { %2644 = vmatprep.subr.bf16.mxu1 %v2752_v38 }
 0x92f   :  { %2646 = vmatpush3.bf16.msra.mxu1 %v2645_v33 }
 0x930   :  { %2647 = vmatprep.subr.bf16.mxu1 %v2752_v38 }
 0x9ed   :  { %v1685_v34 = vpop.f32.mrb[12].mxu1 }
 0x9ee   :  { %v1689_v35 = vmul.f32 0.25, %v1685_v34  ;;  %v2509_v36 = vpop.f32.mrb[13].mxu1 }
 0x9f0   :  { %1691 = vrot.lane.b32.xlu1 %v1689_v35, %s2756_s26 }
 0xa62   :  { %v1692_v39 = vpop.permute.xlu1 %1691 }
 0xa63   :  { %v1694_v42 = vsel %vm1302_vm6, %v3440_v20, %v1692_v39  ;;  %v1795_v20 = vld [vmem:[%s3649_s14 + $0x30] sm:$0xff]  ;;  %s2067_s14 = sshll.u32 %s2757_s11, 4  ;;  %s2068_s14 = int_to_ptr.vmem [resolvable:$true] %s2067_s14 }
 0xa64   :  { %2535 = vmatmul.mubr.msk.f32.vlgmr.msra.gmra.mrb[14].mxu1 %vm1714_vm9, %v1694_v42  ;;  %v2657_v47 = vpack.c.bf16 %v1796_v46, %v1795_v20  ;;  %s2700_s26 = scalar_lea.vmem %s2068_s14, 32  ;;  %p2705_p6 = scmp.lt.s32.totalorder %s2068_s14, %s2068_s14 }
 0xa65   :  { %2649 = vmatpush3.bf16.msra.mxu1 %v2648_v53  ;;  %2553 = vmatprep.mubr.msk.f32.mxu1 %vm2753_vm2, %v2751_v10  ;;  %p2701_p5 = scmp.ne.s32.totalorder %s2068_s14, %s2700_s26  ;;  %p2706_p7 = scmp.lt.s32.totalorder %s2700_s26, %s2700_s26 }
 0xa66   :  { %2650 = vmatprep.subr.bf16.mxu1 %v2752_v38 }
 0xa67   :  { %p2707_p8 = por %p2706_p7, %p2705_p6 }
 0xa69   :  { %2652 = vmatpush3.bf16.msra.mxu1 %v2651_v43  ;;  %p2708_p9 = pnand %p2707_p8, %p2701_p5 }
 0xa6a   :  { %2653 = vmatprep.subr.bf16.mxu1 %v2752_v38 }
 0xa6d   :  { %2655 = vmatpush3.bf16.msra.mxu1 %v2654_v45 }
 0xa6e   :  { %2656 = vmatprep.subr.bf16.mxu1 %v2752_v38 }
 0xa71   :  { %2658 = vmatpush3.bf16.msra.mxu1 %v2657_v47 }
 0xa72   :  { %2659 = vmatprep.subr.bf16.mxu1 %v2752_v38 }
 0xb37   :  { %v1784_v51 = vpop.f32.mrb[14].mxu1 }
 0xb38   :  { %v1785_v52 = vadd.f32 %v2194_v48, %v1784_v51  ;;  %v2536_v54 = vpop.f32.mrb[15].mxu1 }
 0xb3a   :  { %v1788_v5 = vmax.f32 %v1785_v52, 0.0 }
 0xb3c   :  { %2554 = vmatmul.mubr.msk.f32.vlgmr.msra.gmra.mrb[16].mxu1 %vm1302_vm6, %v1788_v5 }
 0xb3d   :  { %2661 = vmatpush3.bf16.msra.mxu1 %v2660_v55  ;;  %2572 = vmatprep.mubr.msk.f32.mxu1 %vm2753_vm2, %v2751_v10 }
 0xb3e   :  { %2662 = vmatprep.subr.bf16.mxu1 %v2752_v38 }
 0xb41   :  { %2664 = vmatpush3.bf16.msra.mxu1 %v2663_v58 }
 0xb42   :  { %2665 = vmatprep.subr.bf16.mxu1 %v2752_v38 }
 0xb45   :  { %2667 = vmatpush3.bf16.msra.mxu1 %v2666_v61 }
 0xb46   :  { %2668 = vmatprep.subr.bf16.mxu1 %v2752_v38 }
 0xb49   :  { %2670 = vmatpush3.bf16.msra.mxu1 %v2669_v1 }
 0xb4a   :  { %2671 = vmatprep.subr.bf16.mxu1 %v2752_v38 }
 0xc0f   :  { %v1873_v7 = vpop.f32.mrb[16].mxu1 }
 0xc10   :  { %v1874_v9 = vadd.f32 %v2196_v6, %v1873_v7  ;;  %v2555_v11 = vpop.f32.mrb[17].mxu1 }
 0xc12   :  { %2573 = vmatmul.mubr.msk.f32.vlgmr.msra.gmra.mrb[18].mxu1 %vm1302_vm6, %v1874_v9 }
 0xc13   :  { %2673 = vmatpush3.bf16.msra.mxu1 %v2672_v8  ;;  %2583 = vmatprep.mubr.msk.f32.mxu1 %vm2753_vm2, %v2751_v10 }
 0xc14   :  { %2674 = vmatprep.subr.bf16.mxu1 %v2752_v38 }
 0xc17   :  { %2676 = vmatpush3.bf16.msra.mxu1 %v2675_v14 }
 0xce5   :  { %v1961_v16 = vpop.f32.mrb[18].mxu1 }
 0xce6   :  { %v1962_v17 = vadd.f32 %v2198_v15, %v1961_v16  ;;  %v2574_v18 = vpop.f32.mrb[19].mxu1 }
 0xce8   :  { %v1965_v10 = vmax.f32 %v1962_v17, 0.0 }
 0xcea   :  { %2584 = vmatmul.mubr.msk.f32.vlgmr.msra.gmra.mrb[20].mxu1 %vm1042_vm4, %v1965_v10 }
 0xceb   :  { %2711 = shalt.err (!%p2708_p9)
}
 0xcec   :  { %s2712_s17 = scalar_lea.hbm %s3656_s21, 32 }
 0xced   :  { %p2713_p10 = scmp.ne.s32.totalorder %s3656_s21, %s2712_s17  ;;  %p2716_p11 = scmp.lt.u32.totalorder %s2712_s17, %s3656_s21 }
 0xcef   :  { %p2718_p12 = pnand %p2716_p11, %p2713_p10 }
 0xcf1   :  { %2721 = shalt.err (!%p2718_p12)
}
 0xcf2   :  { %2070 = dma.vmem_to_hbm [thread:$0]  %s2068_s14, 32, %s3656_s21, [#allocation7]   ;;  %v2200_v38 = vld [vmem:[%s3654_s19] ss:$0 sm:$0xff] }
 0xcf3   :  { %s2758_s5 = smov [#allocation4]  }
 0xcf4   :  { %s2057_s22 = sshll.u32 %s2758_s5, 4  ;;  %s2058_s22 = int_to_ptr.vmem [resolvable:$true] %s2057_s22 }
 0xcf5   :  { %s2722_s7 = scalar_lea.vmem %s2058_s22, 32  ;;  %p2727_p0 = scmp.lt.s32.totalorder %s2058_s22, %s2058_s22 }
 0xcf6   :  { %p2723_p13 = scmp.ne.s32.totalorder %s2058_s22, %s2722_s7  ;;  %p2728_p1 = scmp.lt.s32.totalorder %s2722_s7, %s2722_s7 }
 0xcf8   :  { %p2729_p2 = por %p2728_p1, %p2727_p0 }
 0xcfa   :  { %p2730_p3 = pnand %p2729_p2, %p2723_p13 }
 0xdbd   :  { %v2046_v19 = vpop.f32.mrb[20].mxu1 }
 0xdbe   :  { %v2047_v21 = vadd.f32 %v2200_v38, %v2046_v19  ;;  %v2585_v22 = vpop.f32.mrb[21].mxu1 }
 0xdc0   :  { %2050 = vst.msk [vmem:[#allocation4] sm:$0x3] %vm1379_vm8, %v2047_v21 }
 0xdc1   :  { %2733 = shalt.err (!%p2730_p3)
}
 0xdc2   :  { %s2734_s23 = scalar_lea.hbm %s3655_s20, 32 }
 0xdc3   :  { %p2735_p4 = scmp.ne.s32.totalorder %s3655_s20, %s2734_s23  ;;  %p2738_p5 = scmp.lt.u32.totalorder %s2734_s23, %s3655_s20 }
 0xdc5   :  { %p2740_p6 = pnand %p2738_p5, %p2735_p4 }
 0xdc7   :  { %2743 = shalt.err (!%p2740_p6)
}
 0xdc8   :  { %2060 = dma.vmem_to_hbm [thread:$0]  %s2058_s22, 32, %s3655_s20, [#allocation5]  }
 0xdc9   :  { %2746 = dma.done.wait [#allocation5], 32  }
 0xdca   :  { %2747 = vsyncadd [#allocation5], 4294967264 }
 0xdcb   :  { %2748 = dma.done.wait [#allocation7], 32  }
 0xdcc   :  { %2749 = vsyncadd [#allocation7], 4294967264 }
 0xdcd   :  { %2077 = vsyncpa [#allocation5], 1 }
 0xdce   :  { %2078 = vsyncpa [#allocation7], 1 }

</bundles_post_ra>
